<compile_context>
chip_gen: v6e
topology: v6e:2x2x1
jax: 0.10.0
libtpu: 0.0.40
codegen_flags: <defaults>
</compile_context>

<pallas_src>
import functools

import numpy as np
import jax
import jax.numpy as jnp
from jax.experimental import pallas as pl
from jax.experimental.pallas import tpu as pltpu


_TM_MAX = 2048                        # good on v6e (128 MiB VMEM); within v7x's 64 MiB at K<=3K
_VMEM_SOFT_LIMIT = 12 * 1024 * 1024   # above this, raise the scoped-VMEM limit explicitly
_VMEM_RAISED = 40 * 1024 * 1024       # safe on v5e/v6e (128 MiB phys) and v7x (64 MiB phys)


def _round_up(x, m):
    return ((x + m - 1) // m) * m


def _matmul_tiling(m, x_row_bytes, out_row_bytes, fixed_bytes):
    """Row tile (>=2 grid steps when m > 128 for v7x megacore) + optional VMEM limit."""
    if m <= 128:
        tm = m
    else:
        tm = min(_TM_MAX, _round_up((m + 1) // 2, 128))

    def est(t):
        return 2 * t * (x_row_bytes + out_row_bytes) + fixed_bytes

    while tm > 128 and est(tm) > 2 * _VMEM_SOFT_LIMIT:
        tm = max(128, _round_up(tm // 2, 128))
    limit = _VMEM_RAISED if est(tm) > _VMEM_SOFT_LIMIT else None
    return tm, limit


def _compiler_params(semantics, vmem_limit=None):
    kw = {"dimension_semantics": semantics}
    if vmem_limit is not None:
        kw["vmem_limit_bytes"] = vmem_limit
    return pltpu.CompilerParams(**kw)


# ----------------------------------------------------------------------------
# Pallas kernel 1: fused (M,K)@(K,N) + bias (+ReLU); bf16 operands, f32 accum
# ----------------------------------------------------------------------------
def _matmul_bias_act_kernel(x_ref, w_ref, b_ref, o_ref, *, relu):
    acc = jnp.dot(x_ref[...], w_ref[...], preferred_element_type=jnp.float32)
    acc = acc + b_ref[...]                 # f32 epilogue (v5e has no bf16 VALU)
    if relu:
        acc = jnp.maximum(acc, 0.0)
    o_ref[...] = acc.astype(o_ref.dtype)


def matmul_bias_act(x, w, b, relu=False, out_dtype=jnp.bfloat16):
    """x: (M, K), w: (K, N), b: (1, N) f32 -> (M, N) out_dtype."""
    M, K = x.shape
    K2, N = w.shape
    assert K == K2 and b.shape == (1, N)
    ob = np.dtype(out_dtype).itemsize
    tm, limit = _matmul_tiling(M, K * 2, N * ob, 2 * (K * N * 2 + N * 4))
    grid = (pl.cdiv(M, tm),)               # masked tail stores, no host padding
    return pl.pallas_call(
        functools.partial(_matmul_bias_act_kernel, relu=relu),
        out_shape=jax.ShapeDtypeStruct((M, N), out_dtype),
        grid=grid,
        in_specs=[
            pl.BlockSpec((tm, K), lambda i: (i, 0)),
            pl.BlockSpec((K, N), lambda i: (0, 0)),
            pl.BlockSpec((1, N), lambda i: (0, 0)),
        ],
        out_specs=pl.BlockSpec((tm, N), lambda i: (i, 0)),
        compiler_params=_compiler_params(("parallel",), limit),
    )(x.astype(jnp.bfloat16), w.astype(jnp.bfloat16), b.astype(jnp.float32))


# ----------------------------------------------------------------------------
# Pallas kernel 2: two-operand fused matmul (1x1 proj without HBM concat)
# ----------------------------------------------------------------------------
def _matmul2_bias_kernel(x1_ref, x2_ref, w1_ref, w2_ref, b_ref, o_ref, *, relu):
    acc = jnp.dot(x1_ref[...], w1_ref[...], preferred_element_type=jnp.float32)
    acc = acc + jnp.dot(x2_ref[...], w2_ref[...], preferred_element_type=jnp.float32)
    acc = acc + b_ref[...]
    if relu:
        acc = jnp.maximum(acc, 0.0)
    o_ref[...] = acc.astype(o_ref.dtype)


def matmul2_bias_act(x1, w1, x2, w2, b, relu=False, out_dtype=jnp.float32):
    M, K1 = x1.shape
    M2, K2 = x2.shape
    N = w1.shape[1]
    assert M == M2 and w1.shape == (K1, N) and w2.shape == (K2, N) and b.shape == (1, N)
    ob = np.dtype(out_dtype).itemsize
    tm, limit = _matmul_tiling(M, (K1 + K2) * 2, N * ob,
                               2 * ((K1 + K2) * N * 2 + N * 4))
    grid = (pl.cdiv(M, tm),)
    return pl.pallas_call(
        functools.partial(_matmul2_bias_kernel, relu=relu),
        out_shape=jax.ShapeDtypeStruct((M, N), out_dtype),
        grid=grid,
        in_specs=[
            pl.BlockSpec((tm, K1), lambda i: (i, 0)),
            pl.BlockSpec((tm, K2), lambda i: (i, 0)),
            pl.BlockSpec((K1, N), lambda i: (0, 0)),
            pl.BlockSpec((K2, N), lambda i: (0, 0)),
            pl.BlockSpec((1, N), lambda i: (0, 0)),
        ],
        out_specs=pl.BlockSpec((tm, N), lambda i: (i, 0)),
        compiler_params=_compiler_params(("parallel",), limit),
    )(x1.astype(jnp.bfloat16), x2.astype(jnp.bfloat16),
      w1.astype(jnp.bfloat16), w2.astype(jnp.bfloat16), b.astype(jnp.float32))


# ----------------------------------------------------------------------------
# Pallas kernel 3: batched left matmul out[b] = A @ x[b] (bilinear resize)
# ----------------------------------------------------------------------------
def _bmm_left_kernel(a_ref, x_ref, o_ref):
    o_ref[0] = jnp.dot(a_ref[...], x_ref[0],
                       preferred_element_type=jnp.float32).astype(o_ref.dtype)


def _pick_tr(r):
    if r <= 1024:
        return r
    for tr in (1024, 512, 256, 128):
        if r % tr == 0:
            return tr
    return r


def batched_left_matmul(a, x, out_dtype=jnp.bfloat16):
    """a: (P, Q), x: (B, Q, R) -> (B, P, R); bf16 operands, f32 accumulation."""
    B, Q, R = x.shape
    P, Q2 = a.shape
    assert Q == Q2
    tr = _pick_tr(R)                       # R-tiling keeps blocks small + >=2 steps
    grid = (B, R // tr)
    return pl.pallas_call(
        _bmm_left_kernel,
        out_shape=jax.ShapeDtypeStruct((B, P, R), out_dtype),
        grid=grid,
        in_specs=[
            pl.BlockSpec((P, Q), lambda b, r: (0, 0)),
            pl.BlockSpec((1, Q, tr), lambda b, r: (b, 0, r)),
        ],
        out_specs=pl.BlockSpec((1, P, tr), lambda b, r: (b, 0, r)),
        compiler_params=_compiler_params(("parallel", "parallel")),
    )(a.astype(jnp.bfloat16), x.astype(jnp.bfloat16))


# ----------------------------------------------------------------------------
# Pallas kernel 4: fused 3x3 / stride-2 / pad-1 conv (NHWC) on parity quadrants
# ----------------------------------------------------------------------------
def _conv3x3_s2_kernel(a_ref, bp_ref, cm_ref, ch_ref, dm_ref, dh_ref,
                       w_ref, b_ref, o_ref, *, th, wo, cin, relu):
    m = th * wo

    def tap_dot(tap, widx):
        return jnp.dot(tap.reshape(m, cin),
                       w_ref[widx * cin:(widx + 1) * cin, :],
                       preferred_element_type=jnp.float32)

    a = a_ref[0]                                     # x[2h,   2w  ] : (th,   wo,   cin)
    bp = bp_ref[0]                                   # x[2h,   2w-1] : (th,   wo+1, cin)
    c = jnp.concatenate([cm_ref[0], ch_ref[0]], 0)   # x[2h-1, 2w  ] : (th+1, wo,   cin)
    d = jnp.concatenate([dm_ref[0], dh_ref[0]], 0)   # x[2h-1, 2w-1] : (th+1, wo+1, cin)

    acc = tap_dot(d[:th, :wo], 0)          # tap (i=0, j=0)
    acc = acc + tap_dot(c[:th], 1)         # tap (0, 1)
    acc = acc + tap_dot(d[:th, 1:], 2)     # tap (0, 2)
    acc = acc + tap_dot(bp[:, :wo], 3)     # tap (1, 0)
    acc = acc + tap_dot(a, 4)              # tap (1, 1)
    acc = acc + tap_dot(bp[:, 1:], 5)      # tap (1, 2)
    acc = acc + tap_dot(d[1:, :wo], 6)     # tap (2, 0)
    acc = acc + tap_dot(c[1:], 7)          # tap (2, 1)
    acc = acc + tap_dot(d[1:, 1:], 8)      # tap (2, 2)
    acc = acc + b_ref[...]
    if relu:
        acc = jnp.maximum(acc, 0.0)
    o_ref[...] = acc.reshape(1, th, wo, -1).astype(o_ref.dtype)


def _pick_th(ho, wo, cin, cout, out_bytes, budget=8 * 1024 * 1024):
    """Largest divisor of Ho keeping the double-buffered working set ~<= budget."""
    per_row = wo * (16 * cin + 2 * cout * out_bytes + 4 * cout)
    cap = max(1, min(ho, budget // max(per_row, 1)))
    for th in range(cap, 0, -1):
        if ho % th == 0:
            return th
    return 1


def _conv3x3_s2_fused(x, layer, relu, out_dtype):
    n, h, w, c = x.shape
    ho, wo = h // 2, w // 2
    cout = layer["cout"]
    xb = x.astype(jnp.bfloat16)
    # Space-to-depth parity split (~1x input bytes, vs ~2.25x patch + pad copy).
    # Zero row/col pads on the odd-parity quadrants absorb the conv padding so
    # the kernel never needs boundary masking; row halos are 1-row BlockSpecs.
    qa = xb[:, 0::2, 0::2, :]
    qb = jnp.pad(xb[:, 0::2, 1::2, :], ((0, 0), (0, 0), (1, 0), (0, 0)))
    qc = jnp.pad(xb[:, 1::2, 0::2, :], ((0, 0), (1, 0), (0, 0), (0, 0)))
    qd = jnp.pad(xb[:, 1::2, 1::2, :], ((0, 0), (1, 0), (1, 0), (0, 0)))
    th = _pick_th(ho, wo, c, cout, np.dtype(out_dtype).itemsize)
    grid = (n, ho // th)
    kernel = functools.partial(_conv3x3_s2_kernel, th=th, wo=wo, cin=c, relu=relu)
    return pl.pallas_call(
        kernel,
        out_shape=jax.ShapeDtypeStruct((n, ho, wo, cout), out_dtype),
        grid=grid,
        in_specs=[
            pl.BlockSpec((1, th, wo, c), lambda b, m: (b, m, 0, 0)),
            pl.BlockSpec((1, th, wo + 1, c), lambda b, m: (b, m, 0, 0)),
            pl.BlockSpec((1, th, wo, c), lambda b, m: (b, m, 0, 0)),
            pl.BlockSpec((1, 1, wo, c), lambda b, m: (b, m * th + th, 0, 0)),
            pl.BlockSpec((1, th, wo + 1, c), lambda b, m: (b, m, 0, 0)),
            pl.BlockSpec((1, 1, wo + 1, c), lambda b, m: (b, m * th + th, 0, 0)),
            pl.BlockSpec((9 * c, cout), lambda b, m: (0, 0)),
            pl.BlockSpec((1, cout), lambda b, m: (0, 0)),
        ],
        out_specs=pl.BlockSpec((1, th, wo, cout), lambda b, m: (b, m, 0, 0)),
        compiler_params=_compiler_params(("parallel", "parallel")),
    )(qa, qb, qc, qc, qd, qd, layer["wm"], layer["bm"])


# ----------------------------------------------------------------------------
# Conv layer plumbing (weights pre-reshaped once, exact cout, no lane padding)
# ----------------------------------------------------------------------------
def _prep_conv(key, cout, cin, k):
    fan = cin * k * k
    w = jax.random.normal(key, (cout, cin, k, k), jnp.float32) / jnp.sqrt(float(fan))
    b = jnp.zeros((cout,), jnp.float32)
    # (kh, kw, cin, cout) -> (k*k*cin, cout); tap order matches both conv paths.
    wm = jnp.transpose(w, (2, 3, 1, 0)).reshape(k * k * cin, cout).astype(jnp.bfloat16)
    bm = b.reshape(1, cout)
    return {"wm": wm, "bm": bm, "cout": cout, "cin": cin, "k": k}


def _conv_im2col(x, layer, stride, pad, relu, out_dtype):
    n, h, w, cin = x.shape
    k = layer["k"]
    xb = x.astype(jnp.bfloat16)
    if pad:
        xb = jnp.pad(xb, ((0, 0), (pad, pad), (pad, pad), (0, 0)))
    ho = (h + 2 * pad - k) // stride + 1
    wo = (w + 2 * pad - k) // stride + 1
    if k == 1 and stride == 1:
        pm = xb.reshape(n * ho * wo, cin)
    else:
        slabs = [xb[:, i:i + stride * ho:stride, j:j + stride * wo:stride, :]
                 for i in range(k) for j in range(k)]
        pm = jnp.concatenate(slabs, axis=-1).reshape(n * ho * wo, k * k * cin)
    out = matmul_bias_act(pm, layer["wm"], layer["bm"], relu=relu, out_dtype=out_dtype)
    return out.reshape(n, ho, wo, layer["cout"])


def conv3x3_s2(x, layer, relu=True, out_dtype=jnp.bfloat16):
    n, h, w, cin = x.shape
    assert layer["k"] == 3 and cin == layer["cin"]
    ho, wo = h // 2, w // 2
    if cin >= 32 and ho >= 8 and wo >= 8 and h % 2 == 0 and w % 2 == 0:
        return _conv3x3_s2_fused(x, layer, relu, out_dtype)
    # Lane-tiny channel counts (Cin=3 first layers) and tiny tiles keep im2col.
    return _conv_im2col(x, layer, stride=2, pad=1, relu=relu, out_dtype=out_dtype)


# ----------------------------------------------------------------------------
# Bilinear resize (align_corners=False, PyTorch semantics), NHWC, lane-dense
# ----------------------------------------------------------------------------
def _bilinear_matrix(out_size, in_size):
    out_idx = jnp.arange(out_size)
    src = (out_idx + 0.5) * (in_size / out_size) - 0.5
    src = jnp.maximum(src, 0.0)                    # PyTorch clamps negatives
    lo = jnp.floor(src).astype(jnp.int32)
    hi = jnp.minimum(lo + 1, in_size - 1)
    w_hi = src - lo.astype(jnp.float32)
    w_lo = 1.0 - w_hi
    a = jnp.zeros((out_size, in_size), jnp.float32)
    a = a.at[out_idx, lo].add(w_lo)
    a = a.at[out_idx, hi].add(w_hi)
    return a


def bilinear_resize_nhwc(x, out_h, out_w, out_dtype=jnp.bfloat16):
    n, h, w, c = x.shape
    xb = x.astype(jnp.bfloat16)
    ah = _bilinear_matrix(out_h, h)
    aw = _bilinear_matrix(out_w, w)
    # H pass: lane dim W*C (lane-dense for any C), bf16 intermediate.
    t = batched_left_matmul(ah, xb.reshape(n, h, w * c), out_dtype=jnp.bfloat16)
    if c >= 64:
        # W pass already lane-dense (C lanes).
        o = batched_left_matmul(aw, t.reshape(n * out_h, w, c), out_dtype=out_dtype)
        return o.reshape(n, out_h, out_w, c)
    # Lane-sparse C (heatmap, C=3): fold C into lanes and right-multiply by
    # kron(Aw, I_C)^T through the lane-dense matmul path (unmasked stores).
    bw = jnp.kron(aw, jnp.eye(c, dtype=jnp.float32)).T     # (W*C, out_w*C)
    zb = jnp.zeros((1, out_w * c), jnp.float32)
    o = matmul_bias_act(t.reshape(n * out_h, w * c), bw, zb,
                        relu=False, out_dtype=out_dtype)
    return o.reshape(n, out_h, out_w, c)


# ----------------------------------------------------------------------------
# Model
# ----------------------------------------------------------------------------
class _Raft:
    encoder_dims = [64, 96, 128]
    train_iters = 4
    val_iters = 4
    mixed_precision = False


class _Cfg:
    raft = _Raft()


class RtStereoHumanModel:
    def __init__(self, cfg, with_gs_render=False):
        self.cfg = cfg
        self.with_gs_render = with_gs_render
        self.train_iters = cfg.raft.train_iters
        self.val_iters = cfg.raft.val_iters

        key = jax.random.PRNGKey(42)
        keys = jax.random.split(key, 8)

        # img_encoder = UnetExtractor(in_channel=3, encoder_dim=cfg.raft.encoder_dims)
        # TODO(synk): exact UnetExtractor/PoseExtractor internals are not in the
        # reference snippet; using stride-2 conv(3x3)+ReLU pyramids with matching dims.
        dims = cfg.raft.encoder_dims
        self.img_enc, cin = [], 3
        for i, d in enumerate(dims):
            self.img_enc.append(_prep_conv(keys[i], d, cin, 3))
            cin = d

        pdims = [64, 96, 128]
        self.pose_enc, cin = [], 3
        for i, d in enumerate(pdims):
            self.pose_enc.append(_prep_conv(keys[3 + i], d, cin, 3))
            cin = d

        # conv_proj: 1x1 conv (combined channels -> 96), deterministic init.
        comb_c = dims[-1] + pdims[-1]
        self.conv_proj = _prep_conv(keys[6], 96, comb_c, 1)
        self._proj_split = dims[-1]

    def _encode(self, x, layers):
        feats = []
        for layer in layers:
            x = conv3x3_s2(x, layer, relu=True, out_dtype=jnp.bfloat16)
            feats.append(x)
        return feats

    def forward(self, data, is_train=True):
        bs = data['lmain']['img'].shape[0]
        image = jnp.concatenate([data['lmain']['img'], data['rmain']['img']], axis=0)
        heatmap = jnp.concatenate([data['lmain']['heatmap'], data['rmain']['heatmap']], axis=0)
        flow = jnp.concatenate([data['lmain']['flow'], data['rmain']['flow']], axis=0) if is_train else None
        valid = jnp.concatenate([data['lmain']['valid'], data['rmain']['valid']], axis=0) if is_train else None
        del flow, valid  # consumed only by sequence_loss (see TODO below)

        # One layout conversion at the module boundary; NHWC + bf16 inside
        # (mixed_precision disabled in this synthetic cfg; bf16 operands feed
        #  the MXU with f32 accumulation inside every kernel).
        image_nhwc = jnp.transpose(image, (0, 2, 3, 1))
        heatmap_nhwc = jnp.transpose(heatmap, (0, 2, 3, 1))

        img_feat = self._encode(image_nhwc, self.img_enc)

        # Reference hard-codes (256,256)=img/4 and (128,128)=img/8 for 1024x1024
        # inputs; scaled to the synthetic resolution so shapes stay consistent.
        hm_size = image.shape[2] // 4
        heatmap_resized = bilinear_resize_nhwc(heatmap_nhwc, hm_size, hm_size)
        pose_feat = self._encode(heatmap_resized, self.pose_enc)

        img3 = img_feat[2]                              # (2*bs, H/8, W/8, 128) bf16
        pose3 = pose_feat[2]
        tgt = img3.shape[1]
        pose_resized = bilinear_resize_nhwc(pose3, tgt, tgt)

        # conv_proj (1x1) fused over the two concat halves: no HBM concat of the
        # combined 256-channel feature map; f32 output (matches reference dtype).
        n = img3.shape[0]
        c1 = self._proj_split
        w1 = self.conv_proj["wm"][:c1]
        w2 = self.conv_proj["wm"][c1:]
        m = n * tgt * tgt
        proj = matmul2_bias_act(img3.reshape(m, c1), w1,
                                pose_resized.reshape(m, pose_resized.shape[-1]), w2,
                                self.conv_proj["bm"], relu=False,
                                out_dtype=jnp.float32)
        proj = proj.reshape(n, tgt, tgt, self.conv_proj["cout"])
        proj_nchw = jnp.transpose(proj, (0, 3, 1, 2))   # back to NCHW boundary

        # TODO(synk): RAFTStereoHuman, sequence_loss, GSRegresser / flow2depth /
        # depth2pc are not defined in the reference snippet; the pipeline stops at
        # the projected combined feature (the compute present in the given forward()).
        feat_l, feat_r = jnp.split(proj_nchw, 2, axis=0)
        data['lmain']['feat_proj'] = feat_l
        data['rmain']['feat_proj'] = feat_r
        flow_loss, metrics = None, None
        return data, flow_loss, metrics


# ----------------------------------------------------------------------------
# Driver
# ----------------------------------------------------------------------------
if __name__ == "__main__":
    key = jax.random.PRNGKey(0)
    k1, k2, k3, k4, k5, k6 = jax.random.split(key, 6)

    bs, H, W = 2, 64, 64
    data = {
        'lmain': {
            'img': jax.random.normal(k1, (bs, 3, H, W), jnp.float32),
            'heatmap': jax.random.normal(k2, (bs, 3, H, W), jnp.float32),
            'flow': jax.random.normal(k3, (bs, 2, H, W), jnp.float32),
            'valid': jnp.ones((bs, H, W), jnp.float32),
        },
        'rmain': {
            'img': jax.random.normal(k4, (bs, 3, H, W), jnp.float32),
            'heatmap': jax.random.normal(k5, (bs, 3, H, W), jnp.float32),
            'flow': jax.random.normal(k6, (bs, 2, H, W), jnp.float32),
            'valid': jnp.ones((bs, H, W), jnp.float32),
        },
    }

    model = RtStereoHumanModel(_Cfg(), with_gs_render=False)
    data, flow_loss, metrics = model.forward(data, is_train=True)

    out_l = jax.block_until_ready(data['lmain']['feat_proj'])
    out_r = jax.block_until_ready(data['rmain']['feat_proj'])
    assert out_l.shape == (bs, 96, H // 8, W // 8)
    assert out_r.shape == (bs, 96, H // 8, W // 8)
    assert bool(jnp.all(jnp.isfinite(out_l))) and bool(jnp.all(jnp.isfinite(out_r)))
    print("KERNEL_OK")
</pallas_src>

<mosaic_0001>
module attributes {stable_mosaic.version = 11 : i64} {
  func.func @_matmul_bias_act_kernel(%arg0: i32, %arg1: memref<2048x27xbf16, #tpu.memory_space<vmem>>, %arg2: memref<27x64xbf16, #tpu.memory_space<vmem>>, %arg3: memref<1x64xf32, #tpu.memory_space<vmem>>, %arg4: memref<2048x64xbf16, #tpu.memory_space<vmem>>) attributes {dimension_semantics = [#tpu.dimension_semantics<parallel>], iteration_bounds = array<i64: 2>, scalar_prefetch = 0 : i64, scratch_operands = 0 : i64, tpu.core_type = #tpu.core_type<tc>, window_params = [{transform_indices = @transform_0, window_bounds = array<i64: 2048, 27>}, {pipeline_mode = #tpu.pipeline_mode<synchronous>, transform_indices = @transform_1, window_bounds = array<i64: 27, 64>}, {pipeline_mode = #tpu.pipeline_mode<synchronous>, transform_indices = @transform_2, window_bounds = array<i64: 1, 64>}, {transform_indices = @transform_3, window_bounds = array<i64: 2048, 64>}]} {
    %c0 = arith.constant 0 : index
    %c0_0 = arith.constant 0 : index
    %0 = vector.load %arg1[%c0, %c0_0] : memref<2048x27xbf16, #tpu.memory_space<vmem>>, vector<2048x27xbf16>
    %c0_1 = arith.constant 0 : index
    %c0_2 = arith.constant 0 : index
    %1 = vector.load %arg2[%c0_1, %c0_2] : memref<27x64xbf16, #tpu.memory_space<vmem>>, vector<27x64xbf16>
    %cst = arith.constant dense<0.000000e+00> : vector<2048x64xf32>
    %2 = tpu.matmul %0, %1, %cst {dimension_numbers = #tpu.dot_dimension_numbers<[1], [0], [0], [1], [0, 0, 1, 1], [], []>} : vector<2048x27xbf16>, vector<27x64xbf16>, vector<2048x64xf32> -> vector<2048x64xf32>
    %c0_3 = arith.constant 0 : index
    %c0_4 = arith.constant 0 : index
    %3 = vector.load %arg3[%c0_3, %c0_4] : memref<1x64xf32, #tpu.memory_space<vmem>>, vector<1x64xf32>
    %4 = vector.broadcast %3 : vector<1x64xf32> to vector<2048x64xf32>
    %5 = arith.addf %2, %4 : vector<2048x64xf32>
    %cst_5 = arith.constant 0.000000e+00 : f32
    %6 = vector.broadcast %cst_5 : f32 to vector<2048x64xf32>
    %7 = arith.maximumf %5, %6 : vector<2048x64xf32>
    %8 = arith.truncf %7 : vector<2048x64xf32> to vector<2048x64xbf16>
    %c0_6 = arith.constant 0 : index
    %c0_7 = arith.constant 0 : index
    %9 = vector.load %arg4[%c0_6, %c0_7] : memref<2048x64xbf16, #tpu.memory_space<vmem>>, vector<2048x64xbf16>
    tpu.vector_store %arg4[%c0_6, %c0_7], %8 {strides = array<i32>} : memref<2048x64xbf16, #tpu.memory_space<vmem>>, vector<2048x64xbf16>,
    return
  }
  func.func @transform_0(%arg0: i32) -> (i32, i32) {
    %c0_i32 = arith.constant 0 : i32
    %c0_i32_0 = arith.constant 0 : i32
    return %arg0, %c0_i32 : i32, i32
  }
  func.func @transform_1(%arg0: i32) -> (i32, i32) {
    %c0_i32 = arith.constant 0 : i32
    %c0_i32_0 = arith.constant 0 : i32
    %c0_i32_1 = arith.constant 0 : i32
    return %c0_i32, %c0_i32_0 : i32, i32
  }
  func.func @transform_2(%arg0: i32) -> (i32, i32) {
    %c0_i32 = arith.constant 0 : i32
    %c0_i32_0 = arith.constant 0 : i32
    %c0_i32_1 = arith.constant 0 : i32
    return %c0_i32, %c0_i32_0 : i32, i32
  }
  func.func @transform_3(%arg0: i32) -> (i32, i32) {
    %c0_i32 = arith.constant 0 : i32
    %c0_i32_0 = arith.constant 0 : i32
    return %arg0, %c0_i32 : i32, i32
  }
}

</mosaic_0001>

<bundles_post_ra>
// kernel: tpu_custom_call.1
= control target key start
LH: loop header
LB: loop body
LE: loop exit
PB: predicated region body
PF: predicated region fallthrough
CT: control target
= control target key end

     0   :  { %s5481_s12 = smov 0   ;;  %s6554_s0 = inlined_call_operand.vmem [shape: bf16[4096,27], index: 0, kind: input, shape index: {}]   ;;  %s6555_s1 = inlined_call_operand.vmem [shape: bf16[27,64], index: 1, kind: input, shape index: {}]   ;;  %s6556_s2 = inlined_call_operand.vmem [shape: f32[1,64], index: 2, kind: input, shape index: {}]   ;;  %s6557_s3 = inlined_call_operand.vmem [shape: bf16[4096,64], index: 3, kind: output, shape index: {}]  }
   0x1 LB: > { %s4135_s13 = sadd.s32 4294967295, %s5458_s12   ;;  %p4139_p0 = scmp.ge.s32.totalorder %s5458_s12, 1  ;;  %s5458_s12 = sphi %s5481_s12, %s13_s12  }
   0x2   : > { %p138_p1 = scmp.lt.s32.totalorder %s5458_s12, 3 }
   0x4   : > { %p139_p2 = pnand %p4139_p0, %p138_p1 }
   0x5   : > { %s4140_s16 = sshll.u32 (!%p139_p2), %s4135_s13, 8 }
   0x6   : > { %142 = sbr.rel (%p139_p2) target bundleno = 478 (0x1de), region = 32  ;;  %p163_p3 = scmp.lt.s32.totalorder (!%p139_p2), %s4140_s16, 511 }
   0xb   : > { %v5320_v0 = vld [vmem:[%s6555_s1 + $0x8] sm:$0x3f]   ;;  %vm1478_vm0 = vcmask 1044480   ;;  %vm1479_vm1 = vcmask 1045504   ;;  %v5460_v1 = vmov 65535   ;;  %v5321_v5 = vld [vmem:[%s6555_s1] sm:$0xff]  }
   0xc   : > { %v1480_v2 = vsel %vm1478_vm0, 4294967295, %v5460_v1  ;;  %s6559_s16 = smov (!%p163_p3, %s4140_s16), 511  ;;  %vm1093_vm2 = vcmask 220160   ;;  %vm3822_vm3 = vcmask 519168  }
   0xd   : > { %v1481_v3 = vsel %vm1479_vm1, %v1480_v2, 0  ;;  %s4141_s19 = sshll.u32 %s6559_s16, 2 }
   0xe   : > { %v1483_v4 = vand.u32 %v5320_v0, %v1481_v3  ;;  %s5503_s22 = scalar_lea.vmem %s6554_s0, %s4141_s19  ;;  %s5723_s27 = scalar_lea.vmem %s6557_s3, %s4141_s19 }
   0xf   : > { %v5322_v6 = vld [vmem:[%s5503_s22] sm:$0xff]   ;;  %v5324_v8 = vld [vmem:[%s5503_s22 + $0x8] sm:$0xff]   ;;  %v5326_v10 = vld [vmem:[%s5503_s22 + $0x10] sm:$0xff]  }
  0x10   : > { %5047 = vmatprep.subr.bf16.mxu0 %v1483_v4  ;;  %5307 = vmatprep.subr.bf16.mxu1 %v1483_v4  ;;  %v5323_v7 = vld [vmem:[%s5503_s22 + $0x200] sm:$0xff]   ;;  %v5325_v9 = vld [vmem:[%s5503_s22 + $0x208] sm:$0xff]   ;;  %v5327_v11 = vld [vmem:[%s5503_s22 + $0x210] sm:$0xff]  }
  0x11   : > { %5048 = vmatpush3.bf16.msra.mxu0 %v1483_v4  ;;  %5309 = vmatpush3.bf16.msra.mxu1 %v1483_v4  ;;  %v5328_v12 = vld [vmem:[%s5503_s22 + $0x18] sm:$0xff]   ;;  %v5330_v14 = vld [vmem:[%s5503_s22 + $0x20] sm:$0xff]   ;;  %v5332_v16 = vld [vmem:[%s5503_s22 + $0x28] sm:$0xff]  }
  0x12   : > { %5049 = vmatprep.subr.bf16.mxu0 %v5321_v5  ;;  %5308 = vmatprep.subr.bf16.mxu1 %v5321_v5  ;;  %v5329_v13 = vld [vmem:[%s5503_s22 + $0x218] sm:$0xff]   ;;  %v5331_v15 = vld [vmem:[%s5503_s22 + $0x220] sm:$0xff]   ;;  %v5333_v17 = vld [vmem:[%s5503_s22 + $0x228] sm:$0xff]  }
  0x13   : > { %5051 = vmatprep.mubr.msk.bf16.mxu0 %vm1093_vm2, %v5322_v6  ;;  %5179 = vmatprep.mubr.msk.bf16.mxu1 %vm1093_vm2, %v5323_v7  ;;  %v5334_v18 = vld [vmem:[%s5503_s22 + $0x30] sm:$0xff]   ;;  %v5336_v20 = vld [vmem:[%s5503_s22 + $0x38] sm:$0xff]   ;;  %v5338_v22 = vld [vmem:[%s5503_s22 + $0x40] sm:$0xff]  }
  0x14   : > { %v5335_v19 = vld [vmem:[%s5503_s22 + $0x230] sm:$0xff]   ;;  %v5337_v21 = vld [vmem:[%s5503_s22 + $0x238] sm:$0xff]   ;;  %v5339_v23 = vld [vmem:[%s5503_s22 + $0x240] sm:$0xff]  }
  0x15   : > { %5050 = vmatpush3.bf16.msra.mxu0 %v5321_v5  ;;  %5310 = vmatpush3.bf16.msra.mxu1 %v5321_v5  ;;  %v5340_v24 = vld [vmem:[%s5503_s22 + $0x48] sm:$0xff]   ;;  %v5342_v26 = vld [vmem:[%s5503_s22 + $0x50] sm:$0xff]   ;;  %v5344_v28 = vld [vmem:[%s5503_s22 + $0x58] sm:$0xff]  }
  0x16   : > { %v5341_v25 = vld [vmem:[%s5503_s22 + $0x248] sm:$0xff]   ;;  %v5343_v27 = vld [vmem:[%s5503_s22 + $0x250] sm:$0xff]   ;;  %v5345_v29 = vld [vmem:[%s5503_s22 + $0x258] sm:$0xff]  }
  0x17   : > { %v5346_v30 = vld [vmem:[%s5503_s22 + $0x60] sm:$0xff]   ;;  %v5348_v32 = vld [vmem:[%s5503_s22 + $0x68] sm:$0xff]   ;;  %v5350_v34 = vld [vmem:[%s5503_s22 + $0x70] sm:$0xff]  }
  0x18   : > { %5052 = vmatmul.mubr.msk.bf16.vlgmr.msra.gmra.mxu0 %vm1093_vm2, %v5324_v8  ;;  %5180 = vmatmul.mubr.msk.bf16.vlgmr.msra.gmra.mxu1 %vm1093_vm2, %v5325_v9  ;;  %v5347_v31 = vld [vmem:[%s5503_s22 + $0x260] sm:$0xff]   ;;  %v5349_v33 = vld [vmem:[%s5503_s22 + $0x268] sm:$0xff]   ;;  %v5351_v35 = vld [vmem:[%s5503_s22 + $0x270] sm:$0xff]  }
  0x19   : > { %5055 = vmatprep.mubr.msk.bf16.mxu0 %vm1093_vm2, %v5326_v10  ;;  %5183 = vmatprep.mubr.msk.bf16.mxu1 %vm1093_vm2, %v5327_v11  ;;  %v5352_v36 = vld [vmem:[%s5503_s22 + $0x78] sm:$0xff]   ;;  %v5354_v38 = vld [vmem:[%s5503_s22 + $0x80] sm:$0xff]   ;;  %v5356_v40 = vld [vmem:[%s5503_s22 + $0x88] sm:$0xff]  }
  0x1a   : > { %v5353_v37 = vld [vmem:[%s5503_s22 + $0x278] sm:$0xff]   ;;  %v5355_v39 = vld [vmem:[%s5503_s22 + $0x280] sm:$0xff]   ;;  %v5357_v41 = vld [vmem:[%s5503_s22 + $0x288] sm:$0xff]  }
  0x1b   : > { %v5358_v42 = vld [vmem:[%s5503_s22 + $0x90] sm:$0xff]   ;;  %v5360_v44 = vld [vmem:[%s5503_s22 + $0x98] sm:$0xff]   ;;  %v5362_v46 = vld [vmem:[%s5503_s22 + $0xa0] sm:$0xff]  }
  0x1c   : > { %v5359_v43 = vld [vmem:[%s5503_s22 + $0x290] sm:$0xff]   ;;  %v5361_v45 = vld [vmem:[%s5503_s22 + $0x298] sm:$0xff]   ;;  %v5363_v47 = vld [vmem:[%s5503_s22 + $0x2a0] sm:$0xff]  }
  0x1d   : > { %v5364_v48 = vld [vmem:[%s5503_s22 + $0xa8] sm:$0xff]   ;;  %v5366_v50 = vld [vmem:[%s5503_s22 + $0xb0] sm:$0xff]   ;;  %v5368_v52 = vld [vmem:[%s5503_s22 + $0xb8] sm:$0xff]  }
  0x1e   : > { %v5365_v49 = vld [vmem:[%s5503_s22 + $0x2a8] sm:$0xff]   ;;  %v5367_v51 = vld [vmem:[%s5503_s22 + $0x2b0] sm:$0xff]   ;;  %v5369_v53 = vld [vmem:[%s5503_s22 + $0x2b8] sm:$0xff]  }
  0x1f   : > { %v5370_v54 = vld [vmem:[%s5503_s22 + $0xc0] sm:$0xff]   ;;  %v5372_v56 = vld [vmem:[%s5503_s22 + $0xc8] sm:$0xff]   ;;  %v5374_v58 = vld [vmem:[%s5503_s22 + $0xd0] sm:$0xff]  }
  0x20   : > { %5056 = vmatmul.mubr.msk.bf16.gmra.mxu0 %vm1093_vm2, %v5328_v12  ;;  %5184 = vmatmul.mubr.msk.bf16.gmra.mxu1 %vm1093_vm2, %v5329_v13  ;;  %v5371_v55 = vld [vmem:[%s5503_s22 + $0x2c0] sm:$0xff]   ;;  %v5373_v57 = vld [vmem:[%s5503_s22 + $0x2c8] sm:$0xff]   ;;  %v5375_v59 = vld [vmem:[%s5503_s22 + $0x2d0] sm:$0xff]  }
  0x21   : > { %5059 = vmatprep.mubr.msk.bf16.mxu0 %vm1093_vm2, %v5330_v14  ;;  %5187 = vmatprep.mubr.msk.bf16.mxu1 %vm1093_vm2, %v5331_v15  ;;  %v5376_v60 = vld [vmem:[%s5503_s22 + $0xd8] sm:$0xff]   ;;  %v5378_v62 = vld [vmem:[%s5503_s22 + $0xe0] sm:$0xff]   ;;  %v5380_v0 = vld [vmem:[%s5503_s22 + $0xe8] sm:$0xff]  }
  0x22   : > { %v5377_v61 = vld [vmem:[%s5503_s22 + $0x2d8] sm:$0xff]   ;;  %v5379_v63 = vld [vmem:[%s5503_s22 + $0x2e0] sm:$0xff]   ;;  %v5381_v1 = vld [vmem:[%s5503_s22 + $0x2e8] sm:$0xff]  }
  0x23   : > { %v5382_v2 = vld [vmem:[%s5503_s22 + $0xf0] sm:$0xff]   ;;  %v5384_v4 = vld [vmem:[%s5503_s22 + $0xf8] sm:$0xff]   ;;  %v5386_v6 = vld [vmem:[%s5503_s22 + $0x100] sm:$0xff]  }
  0x24   : > { %v5383_v3 = vld [vmem:[%s5503_s22 + $0x2f0] sm:$0xff]   ;;  %v5385_v5 = vld [vmem:[%s5503_s22 + $0x2f8] sm:$0xff]   ;;  %v5387_v7 = vld [vmem:[%s5503_s22 + $0x300] sm:$0xff]  }
  0x25   : > { %v5388_v8 = vld [vmem:[%s5503_s22 + $0x108] sm:$0xff]   ;;  %v5390_v10 = vld [vmem:[%s5503_s22 + $0x110] sm:$0xff]   ;;  %v5392_v12 = vld [vmem:[%s5503_s22 + $0x118] sm:$0xff]  }
  0x26   : > { %v5389_v9 = vld [vmem:[%s5503_s22 + $0x308] sm:$0xff]   ;;  %v5391_v11 = vld [vmem:[%s5503_s22 + $0x310] sm:$0xff]   ;;  %v5393_v13 = vld [vmem:[%s5503_s22 + $0x318] sm:$0xff]  }
  0x27   : > { %v5394_v14 = vld [vmem:[%s5503_s22 + $0x120] sm:$0xff]  }
  0x28   : > { %5060 = vmatmul.mubr.msk.bf16.gmra.mxu0 %vm1093_vm2, %v5332_v16  ;;  %5188 = vmatmul.mubr.msk.bf16.gmra.mxu1 %vm1093_vm2, %v5333_v17  ;;  %v5395_v15 = vld [vmem:[%s5503_s22 + $0x320] sm:$0xff]   ;;  %v5396_v16 = vld [vmem:[%s5503_s22 + $0x128] sm:$0xff]  }
  0x29   : > { %5063 = vmatprep.mubr.msk.bf16.mxu0 %vm1093_vm2, %v5334_v18  ;;  %5191 = vmatprep.mubr.msk.bf16.mxu1 %vm1093_vm2, %v5335_v19  ;;  %v5397_v17 = vld [vmem:[%s5503_s22 + $0x328] sm:$0xff]   ;;  %v5398_v18 = vld [vmem:[%s5503_s22 + $0x130] sm:$0xff]  }
  0x2a   : > { %v5399_v19 = vld [vmem:[%s5503_s22 + $0x330] sm:$0xff]  }
  0x30   : > { %5064 = vmatmul.mubr.msk.bf16.gmra.mxu0 %vm1093_vm2, %v5336_v20  ;;  %5192 = vmatmul.mubr.msk.bf16.gmra.mxu1 %vm1093_vm2, %v5337_v21  ;;  %v5400_v20 = vld [vmem:[%s5503_s22 + $0x138] sm:$0xff]  }
  0x31   : > { %5067 = vmatprep.mubr.msk.bf16.mxu0 %vm1093_vm2, %v5338_v22  ;;  %5195 = vmatprep.mubr.msk.bf16.mxu1 %vm1093_vm2, %v5339_v23  ;;  %v5401_v21 = vld [vmem:[%s5503_s22 + $0x338] sm:$0xff]   ;;  %v5402_v22 = vld [vmem:[%s5503_s22 + $0x140] sm:$0xff]  }
  0x32   : > { %v5403_v23 = vld [vmem:[%s5503_s22 + $0x340] sm:$0xff]  }
  0x38   : > { %5068 = vmatmul.mubr.msk.bf16.gmra.mxu0 %vm1093_vm2, %v5340_v24  ;;  %5196 = vmatmul.mubr.msk.bf16.gmra.mxu1 %vm1093_vm2, %v5341_v25  ;;  %v5404_v24 = vld [vmem:[%s5503_s22 + $0x148] sm:$0xff]  }
  0x39   : > { %5071 = vmatprep.mubr.msk.bf16.mxu0 %vm1093_vm2, %v5342_v26  ;;  %5199 = vmatprep.mubr.msk.bf16.mxu1 %vm1093_vm2, %v5343_v27  ;;  %v5405_v25 = vld [vmem:[%s5503_s22 + $0x348] sm:$0xff]   ;;  %v5406_v26 = vld [vmem:[%s5503_s22 + $0x150] sm:$0xff]  }
  0x3a   : > { %v5407_v27 = vld [vmem:[%s5503_s22 + $0x350] sm:$0xff]  }
  0x40   : > { %5072 = vmatmul.mubr.msk.bf16.gmra.mxu0 %vm1093_vm2, %v5344_v28  ;;  %5200 = vmatmul.mubr.msk.bf16.gmra.mxu1 %vm1093_vm2, %v5345_v29  ;;  %v5408_v28 = vld [vmem:[%s5503_s22 + $0x158] sm:$0xff]  }
  0x41   : > { %5075 = vmatprep.mubr.msk.bf16.mxu0 %vm1093_vm2, %v5346_v30  ;;  %5203 = vmatprep.mubr.msk.bf16.mxu1 %vm1093_vm2, %v5347_v31  ;;  %v5409_v29 = vld [vmem:[%s5503_s22 + $0x358] sm:$0xff]   ;;  %v5410_v30 = vld [vmem:[%s5503_s22 + $0x160] sm:$0xff]  }
  0x42   : > { %v5411_v31 = vld [vmem:[%s5503_s22 + $0x360] sm:$0xff]  }
  0x48   : > { %5076 = vmatmul.mubr.msk.bf16.gmra.mxu0 %vm1093_vm2, %v5348_v32  ;;  %5204 = vmatmul.mubr.msk.bf16.gmra.mxu1 %vm1093_vm2, %v5349_v33  ;;  %v5412_v32 = vld [vmem:[%s5503_s22 + $0x168] sm:$0xff]  }
  0x49   : > { %5079 = vmatprep.mubr.msk.bf16.mxu0 %vm1093_vm2, %v5350_v34  ;;  %5207 = vmatprep.mubr.msk.bf16.mxu1 %vm1093_vm2, %v5351_v35  ;;  %v5413_v33 = vld [vmem:[%s5503_s22 + $0x368] sm:$0xff]   ;;  %v5414_v34 = vld [vmem:[%s5503_s22 + $0x170] sm:$0xff]  }
  0x4a   : > { %v5415_v35 = vld [vmem:[%s5503_s22 + $0x370] sm:$0xff]  }
  0x50   : > { %5080 = vmatmul.mubr.msk.bf16.gmra.mxu0 %vm1093_vm2, %v5352_v36  ;;  %5208 = vmatmul.mubr.msk.bf16.gmra.mxu1 %vm1093_vm2, %v5353_v37  ;;  %v5416_v36 = vld [vmem:[%s5503_s22 + $0x178] sm:$0xff]  }
  0x51   : > { %5083 = vmatprep.mubr.msk.bf16.mxu0 %vm1093_vm2, %v5354_v38  ;;  %5211 = vmatprep.mubr.msk.bf16.mxu1 %vm1093_vm2, %v5355_v39  ;;  %v5417_v37 = vld [vmem:[%s5503_s22 + $0x378] sm:$0xff]   ;;  %v5418_v38 = vld [vmem:[%s5503_s22 + $0x180] sm:$0xff]  }
  0x52   : > { %v5419_v39 = vld [vmem:[%s5503_s22 + $0x380] sm:$0xff]  }
  0x58   : > { %5084 = vmatmul.mubr.msk.bf16.gmra.mxu0 %vm1093_vm2, %v5356_v40  ;;  %5212 = vmatmul.mubr.msk.bf16.gmra.mxu1 %vm1093_vm2, %v5357_v41  ;;  %v5420_v40 = vld [vmem:[%s5503_s22 + $0x188] sm:$0xff]  }
  0x59   : > { %5087 = vmatprep.mubr.msk.bf16.mxu0 %vm1093_vm2, %v5358_v42  ;;  %5215 = vmatprep.mubr.msk.bf16.mxu1 %vm1093_vm2, %v5359_v43  ;;  %v5421_v41 = vld [vmem:[%s5503_s22 + $0x388] sm:$0xff]   ;;  %v5422_v42 = vld [vmem:[%s5503_s22 + $0x190] sm:$0xff]  }
  0x5a   : > { %v5423_v43 = vld [vmem:[%s5503_s22 + $0x390] sm:$0xff]  }
  0x60   : > { %5088 = vmatmul.mubr.msk.bf16.gmra.mxu0 %vm1093_vm2, %v5360_v44  ;;  %5216 = vmatmul.mubr.msk.bf16.gmra.mxu1 %vm1093_vm2, %v5361_v45  ;;  %v5708_v44 = vld [vmem:[%s6556_s2] ss:$0 sm:$0xff] }
  0x61   : > { %5091 = vmatprep.mubr.msk.bf16.mxu0 %vm1093_vm2, %v5362_v46  ;;  %5219 = vmatprep.mubr.msk.bf16.mxu1 %vm1093_vm2, %v5363_v47 }
  0x68   : > { %5092 = vmatmul.mubr.msk.bf16.gmra.mxu0 %vm1093_vm2, %v5364_v48  ;;  %5220 = vmatmul.mubr.msk.bf16.gmra.mxu1 %vm1093_vm2, %v5365_v49 }
  0x69   : > { %5095 = vmatprep.mubr.msk.bf16.mxu0 %vm1093_vm2, %v5366_v50  ;;  %5223 = vmatprep.mubr.msk.bf16.mxu1 %vm1093_vm2, %v5367_v51 }
  0x70   : > { %5096 = vmatmul.mubr.msk.bf16.gmra.mxu0 %vm1093_vm2, %v5368_v52  ;;  %5224 = vmatmul.mubr.msk.bf16.gmra.mxu1 %vm1093_vm2, %v5369_v53 }
  0x71   : > { %5099 = vmatprep.mubr.msk.bf16.mxu0 %vm1093_vm2, %v5370_v54  ;;  %5227 = vmatprep.mubr.msk.bf16.mxu1 %vm1093_vm2, %v5371_v55 }
  0x78   : > { %5100 = vmatmul.mubr.msk.bf16.gmra.mxu0 %vm1093_vm2, %v5372_v56  ;;  %5228 = vmatmul.mubr.msk.bf16.gmra.mxu1 %vm1093_vm2, %v5373_v57  ;;  %v5424_v57 = vld [vmem:[%s5503_s22 + $0x198] sm:$0xff]  }
  0x79   : > { %5103 = vmatprep.mubr.msk.bf16.mxu0 %vm1093_vm2, %v5374_v58  ;;  %5231 = vmatprep.mubr.msk.bf16.mxu1 %vm1093_vm2, %v5375_v59  ;;  %v5425_v58 = vld [vmem:[%s5503_s22 + $0x398] sm:$0xff]  }
  0x80   : > { %5104 = vmatmul.mubr.msk.bf16.gmra.mxu0 %vm1093_vm2, %v5376_v60  ;;  %5232 = vmatmul.mubr.msk.bf16.gmra.mxu1 %vm1093_vm2, %v5377_v61 }
  0x81   : > { %5107 = vmatprep.mubr.msk.bf16.mxu0 %vm1093_vm2, %v5378_v62  ;;  %5235 = vmatprep.mubr.msk.bf16.mxu1 %vm1093_vm2, %v5379_v63  ;;  %v5426_v63 = vld [vmem:[%s5503_s22 + $0x1a0] sm:$0xff]  }
  0x88   : > { %5108 = vmatmul.mubr.msk.bf16.gmra.mxu0 %vm1093_vm2, %v5380_v0  ;;  %5236 = vmatmul.mubr.msk.bf16.gmra.mxu1 %vm1093_vm2, %v5381_v1  ;;  %v5427_v0 = vld [vmem:[%s5503_s22 + $0x3a0] sm:$0xff]  }
  0x89   : > { %5111 = vmatprep.mubr.msk.bf16.mxu0 %vm1093_vm2, %v5382_v2  ;;  %5239 = vmatprep.mubr.msk.bf16.mxu1 %vm1093_vm2, %v5383_v3 }
  0x90   : > { %5112 = vmatmul.mubr.msk.bf16.gmra.mxu0 %vm1093_vm2, %v5384_v4  ;;  %5240 = vmatmul.mubr.msk.bf16.gmra.mxu1 %vm1093_vm2, %v5385_v5 }
  0x91   : > { %5115 = vmatprep.mubr.msk.bf16.mxu0 %vm1093_vm2, %v5386_v6  ;;  %5243 = vmatprep.mubr.msk.bf16.mxu1 %vm1093_vm2, %v5387_v7 }
  0x98   : > { %5116 = vmatmul.mubr.msk.bf16.gmra.mxu0 %vm1093_vm2, %v5388_v8  ;;  %5244 = vmatmul.mubr.msk.bf16.gmra.mxu1 %vm1093_vm2, %v5389_v9 }
  0x99   : > { %5119 = vmatprep.mubr.msk.bf16.mxu0 %vm1093_vm2, %v5390_v10  ;;  %5247 = vmatprep.mubr.msk.bf16.mxu1 %vm1093_vm2, %v5391_v11 }
  0xa0   : > { %5120 = vmatmul.mubr.msk.bf16.gmra.mxu0 %vm1093_vm2, %v5392_v12  ;;  %5248 = vmatmul.mubr.msk.bf16.gmra.mxu1 %vm1093_vm2, %v5393_v13 }
  0xa1   : > { %5123 = vmatprep.mubr.msk.bf16.mxu0 %vm1093_vm2, %v5394_v14  ;;  %5251 = vmatprep.mubr.msk.bf16.mxu1 %vm1093_vm2, %v5395_v15 }
  0xa8   : > { %5124 = vmatmul.mubr.msk.bf16.gmra.mxu0 %vm1093_vm2, %v5396_v16  ;;  %5252 = vmatmul.mubr.msk.bf16.gmra.mxu1 %vm1093_vm2, %v5397_v17 }
  0xa9   : > { %5127 = vmatprep.mubr.msk.bf16.mxu0 %vm1093_vm2, %v5398_v18  ;;  %5255 = vmatprep.mubr.msk.bf16.mxu1 %vm1093_vm2, %v5399_v19 }
  0xb0   : > { %5128 = vmatmul.mubr.msk.bf16.gmra.mxu0 %vm1093_vm2, %v5400_v20  ;;  %5256 = vmatmul.mubr.msk.bf16.gmra.mxu1 %vm1093_vm2, %v5401_v21 }
  0xb1   : > { %5131 = vmatprep.mubr.msk.bf16.mxu0 %vm1093_vm2, %v5402_v22  ;;  %5259 = vmatprep.mubr.msk.bf16.mxu1 %vm1093_vm2, %v5403_v23 }
  0xb8   : > { %5132 = vmatmul.mubr.msk.bf16.gmra.mxu0 %vm1093_vm2, %v5404_v24  ;;  %5260 = vmatmul.mubr.msk.bf16.gmra.mxu1 %vm1093_vm2, %v5405_v25 }
  0xb9   : > { %5135 = vmatprep.mubr.msk.bf16.mxu0 %vm1093_vm2, %v5406_v26  ;;  %5263 = vmatprep.mubr.msk.bf16.mxu1 %vm1093_vm2, %v5407_v27 }
  0xc0   : > { %5136 = vmatmul.mubr.msk.bf16.gmra.mxu0 %vm1093_vm2, %v5408_v28  ;;  %5264 = vmatmul.mubr.msk.bf16.gmra.mxu1 %vm1093_vm2, %v5409_v29  ;;  %v5428_v29 = vld [vmem:[%s5503_s22 + $0x1a8] sm:$0xff]  }
  0xc1   : > { %5139 = vmatprep.mubr.msk.bf16.mxu0 %vm1093_vm2, %v5410_v30  ;;  %5267 = vmatprep.mubr.msk.bf16.mxu1 %vm1093_vm2, %v5411_v31  ;;  %v5429_v30 = vld [vmem:[%s5503_s22 + $0x3a8] sm:$0xff]  }
  0xc8   : > { %5140 = vmatmul.mubr.msk.bf16.gmra.mxu0 %vm1093_vm2, %v5412_v32  ;;  %5268 = vmatmul.mubr.msk.bf16.gmra.mxu1 %vm1093_vm2, %v5413_v33 }
  0xc9   : > { %5143 = vmatprep.mubr.msk.bf16.mxu0 %vm1093_vm2, %v5414_v34  ;;  %5271 = vmatprep.mubr.msk.bf16.mxu1 %vm1093_vm2, %v5415_v35  ;;  %v5430_v35 = vld [vmem:[%s5503_s22 + $0x1b0] sm:$0xff]  }
  0xd0   : > { %5144 = vmatmul.mubr.msk.bf16.gmra.mxu0 %vm1093_vm2, %v5416_v36  ;;  %5272 = vmatmul.mubr.msk.bf16.gmra.mxu1 %vm1093_vm2, %v5417_v37  ;;  %v5431_v36 = vld [vmem:[%s5503_s22 + $0x3b0] sm:$0xff]  }
  0xd1   : > { %5147 = vmatprep.mubr.msk.bf16.mxu0 %vm1093_vm2, %v5418_v38  ;;  %5275 = vmatprep.mubr.msk.bf16.mxu1 %vm1093_vm2, %v5419_v39 }
  0xd8   : > { %v5053_v45 = vpop.f32.mrf.mxu0  ;;  %5148 = vmatmul.mubr.msk.bf16.gmra.mxu0 %vm1093_vm2, %v5420_v40  ;;  %v5181_v46 = vpop.f32.mrf.mxu1  ;;  %5276 = vmatmul.mubr.msk.bf16.gmra.mxu1 %vm1093_vm2, %v5421_v41 }
  0xd9   : > { %v1528_v47 = vadd.f32 %v5053_v45, %v5708_v44  ;;  %v2040_v48 = vadd.f32 %v5181_v46, %v5708_v44  ;;  %5151 = vmatprep.mubr.msk.bf16.mxu0 %vm1093_vm2, %v5422_v42  ;;  %5279 = vmatprep.mubr.msk.bf16.mxu1 %vm1093_vm2, %v5423_v43 }
  0xda   : > { %v1519_v49 = vpop.f32.mrf.mxu0  ;;  %v2031_v50 = vpop.f32.mrf.mxu1 }
  0xdb   : > { %v2544_v51 = vmax.f32 %v1528_v47, 0.0  ;;  %v2672_v52 = vmax.f32 %v2040_v48, 0.0  ;;  %v1520_v53 = vadd.f32 %v5708_v44, %v1519_v49  ;;  %v2032_v54 = vadd.f32 %v5708_v44, %v2031_v50 }
  0xdc   : > { %v5054_v55 = vpop.f32.mrf.mxu0  ;;  %v5182_v56 = vpop.f32.mrf.mxu1 }
  0xdd   : > { %v4663_v59 = vpack.c.bf16 %v2544_v51, %v2544_v51  ;;  %v4791_v60 = vpack.c.bf16 %v2672_v52, %v2672_v52  ;;  %v2542_v61 = vmax.f32 %v1520_v53, 0.0  ;;  %v2670_v62 = vmax.f32 %v2032_v54, 0.0 }
  0xde   : > { %v1531_v1 = vadd.f32 %v5054_v55, %v5708_v44  ;;  %v2043_v2 = vadd.f32 %v5182_v56, %v5708_v44  ;;  %v1522_v3 = vpop.f32.mrf.mxu0  ;;  %v2034_v4 = vpop.f32.mrf.mxu1 }
  0xdf   : > { %3825 = vst.msk [vmem:[%s5723_s27 + $0x8] sm:$0xf] %vm3822_vm3, %v4663_v59  ;;  %3953 = vst.msk [vmem:[%s5723_s27 + $0x208] sm:$0xf] %vm3822_vm3, %v4791_v60  ;;  %v4661_v5 = vpack.c.bf16 %v2542_v61, %v2542_v61  ;;  %v4789_v6 = vpack.c.bf16 %v2670_v62, %v2670_v62  ;;  %v1523_v7 = vadd.f32 %v5708_v44, %v1522_v3  ;;  %v5433_v3 = vld [vmem:[%s5503_s22 + $0x3b8] sm:$0xff]  }
  0xe0   : > { %v2035_v8 = vadd.f32 %v5708_v44, %v2034_v4  ;;  %v2545_v9 = vmax.f32 %v1531_v1, 0.0  ;;  %v2673_v10 = vmax.f32 %v2043_v2, 0.0  ;;  %v5057_v11 = vpop.f32.mrf.mxu0  ;;  %5152 = vmatmul.mubr.msk.bf16.gmra.mxu0 %vm1093_vm2, %v5424_v57  ;;  %v5185_v12 = vpop.f32.mrf.mxu1  ;;  %5280 = vmatmul.mubr.msk.bf16.gmra.mxu1 %vm1093_vm2, %v5425_v58  ;;  %v5432_v2 = vld [vmem:[%s5503_s22 + $0x1b8] sm:$0xff]  }
  0xe1   : > { %3823 = vst.msk [vmem:[%s5723_s27] sm:$0xf] %vm3822_vm3, %v4661_v5  ;;  %3951 = vst.msk [vmem:[%s5723_s27 + $0x200] sm:$0xf] %vm3822_vm3, %v4789_v6  ;;  %v2543_v13 = vmax.f32 %v1523_v7, 0.0  ;;  %v1544_v15 = vadd.f32 %v5057_v11, %v5708_v44  ;;  %v2056_v16 = vadd.f32 %v5185_v12, %v5708_v44  ;;  %5155 = vmatprep.mubr.msk.bf16.mxu0 %vm1093_vm2, %v5426_v63  ;;  %5283 = vmatprep.mubr.msk.bf16.mxu1 %vm1093_vm2, %v5427_v0 }
  0xe2   : > { %v2671_v14 = vmax.f32 %v2035_v8, 0.0  ;;  %v4664_v17 = vpack.c.bf16 %v2545_v9, %v2545_v9  ;;  %v4792_v18 = vpack.c.bf16 %v2673_v10, %v2673_v10  ;;  %v1535_v19 = vpop.f32.mrf.mxu0  ;;  %v2047_v20 = vpop.f32.mrf.mxu1  ;;  %v5434_v8 = vld [vmem:[%s5503_s22 + $0x1c0] sm:$0xff]  }
  0xe3   : > { %v4662_v21 = vpack.c.bf16 %v2543_v13, %v2543_v13  ;;  %v2548_v23 = vmax.f32 %v1544_v15, 0.0  ;;  %v2676_v24 = vmax.f32 %v2056_v16, 0.0  ;;  %v1536_v25 = vadd.f32 %v5708_v44, %v1535_v19  ;;  %v5435_v13 = vld [vmem:[%s5503_s22 + $0x3c0] sm:$0xff]  }
  0xe4   : > { %v4790_v22 = vpack.c.bf16 %v2671_v14, %v2671_v14  ;;  %3826 = vst.msk [vmem:[%s5723_s27 + $0xc] sm:$0xf] %vm3822_vm3, %v4664_v17  ;;  %3954 = vst.msk [vmem:[%s5723_s27 + $0x20c] sm:$0xf] %vm3822_vm3, %v4792_v18  ;;  %v2048_v26 = vadd.f32 %v5708_v44, %v2047_v20  ;;  %v5058_v27 = vpop.f32.mrf.mxu0  ;;  %v5186_v28 = vpop.f32.mrf.mxu1 }
  0xe5   : > { %3824 = vst.msk [vmem:[%s5723_s27 + $0x4] sm:$0xf] %vm3822_vm3, %v4662_v21  ;;  %v4667_v31 = vpack.c.bf16 %v2548_v23, %v2548_v23  ;;  %v4795_v32 = vpack.c.bf16 %v2676_v24, %v2676_v24  ;;  %v1547_v33 = vadd.f32 %v5058_v27, %v5708_v44  ;;  %v2059_v34 = vadd.f32 %v5186_v28, %v5708_v44 }
  0xe6   : > { %3952 = vst.msk [vmem:[%s5723_s27 + $0x204] sm:$0xf] %vm3822_vm3, %v4790_v22  ;;  %v2546_v37 = vmax.f32 %v1536_v25, 0.0  ;;  %v2674_v38 = vmax.f32 %v2048_v26, 0.0  ;;  %v1538_v39 = vpop.f32.mrf.mxu0  ;;  %v2050_v40 = vpop.f32.mrf.mxu1 }
  0xe7   : > { %3829 = vst.msk [vmem:[%s5723_s27 + $0x18] sm:$0xf] %vm3822_vm3, %v4667_v31  ;;  %3957 = vst.msk [vmem:[%s5723_s27 + $0x218] sm:$0xf] %vm3822_vm3, %v4795_v32  ;;  %v2549_v41 = vmax.f32 %v1547_v33, 0.0  ;;  %v2677_v42 = vmax.f32 %v2059_v34, 0.0  ;;  %v1539_v43 = vadd.f32 %v5708_v44, %v1538_v39  ;;  %v2051_v45 = vadd.f32 %v5708_v44, %v2050_v40 }
  0xe8   : > { %v4665_v46 = vpack.c.bf16 %v2546_v37, %v2546_v37  ;;  %v4793_v47 = vpack.c.bf16 %v2674_v38, %v2674_v38  ;;  %v5061_v48 = vpop.f32.mrf.mxu0  ;;  %5156 = vmatmul.mubr.msk.bf16.gmra.mxu0 %vm1093_vm2, %v5428_v29  ;;  %v5189_v49 = vpop.f32.mrf.mxu1  ;;  %5284 = vmatmul.mubr.msk.bf16.gmra.mxu1 %vm1093_vm2, %v5429_v30  ;;  %v5436_v38 = vld [vmem:[%s5503_s22 + $0x1c8] sm:$0xff]  }
  0xe9   : > { %v4668_v50 = vpack.c.bf16 %v2549_v41, %v2549_v41  ;;  %v4796_v51 = vpack.c.bf16 %v2677_v42, %v2677_v42  ;;  %v2547_v52 = vmax.f32 %v1539_v43, 0.0  ;;  %v2675_v53 = vmax.f32 %v2051_v45, 0.0  ;;  %5159 = vmatprep.mubr.msk.bf16.mxu0 %vm1093_vm2, %v5430_v35  ;;  %5287 = vmatprep.mubr.msk.bf16.mxu1 %vm1093_vm2, %v5431_v36  ;;  %v5437_v39 = vld [vmem:[%s5503_s22 + $0x3c8] sm:$0xff]   ;;  %v5438_v45 = vld [vmem:[%s5503_s22 + $0x1d0] sm:$0xff]  }
  0xea   : > { %3827 = vst.msk [vmem:[%s5723_s27 + $0x10] sm:$0xf] %vm3822_vm3, %v4665_v46  ;;  %3955 = vst.msk [vmem:[%s5723_s27 + $0x210] sm:$0xf] %vm3822_vm3, %v4793_v47  ;;  %v1560_v54 = vadd.f32 %v5061_v48, %v5708_v44  ;;  %v2072_v55 = vadd.f32 %v5189_v49, %v5708_v44  ;;  %v1551_v56 = vpop.f32.mrf.mxu0  ;;  %v2063_v57 = vpop.f32.mrf.mxu1  ;;  %v5439_v46 = vld [vmem:[%s5503_s22 + $0x3d0] sm:$0xff]  }
  0xeb   : > { %3830 = vst.msk [vmem:[%s5723_s27 + $0x1c] sm:$0xf] %vm3822_vm3, %v4668_v50  ;;  %3958 = vst.msk [vmem:[%s5723_s27 + $0x21c] sm:$0xf] %vm3822_vm3, %v4796_v51  ;;  %v4666_v58 = vpack.c.bf16 %v2547_v52, %v2547_v52  ;;  %v4794_v59 = vpack.c.bf16 %v2675_v53, %v2675_v53  ;;  %v1552_v60 = vadd.f32 %v5708_v44, %v1551_v56 }
  0xec   : > { %v2064_v61 = vadd.f32 %v5708_v44, %v2063_v57  ;;  %v2552_v62 = vmax.f32 %v1560_v54, 0.0  ;;  %v2680_v63 = vmax.f32 %v2072_v55, 0.0  ;;  %v5062_v0 = vpop.f32.mrf.mxu0  ;;  %v5190_v1 = vpop.f32.mrf.mxu1 }
  0xed   : > { %3828 = vst.msk [vmem:[%s5723_s27 + $0x14] sm:$0xf] %vm3822_vm3, %v4666_v58  ;;  %3956 = vst.msk [vmem:[%s5723_s27 + $0x214] sm:$0xf] %vm3822_vm3, %v4794_v59  ;;  %v2550_v4 = vmax.f32 %v1552_v60, 0.0  ;;  %v1563_v6 = vadd.f32 %v5062_v0, %v5708_v44  ;;  %v2075_v7 = vadd.f32 %v5190_v1, %v5708_v44 }
  0xee   : > { %v2678_v5 = vmax.f32 %v2064_v61, 0.0  ;;  %v4671_v9 = vpack.c.bf16 %v2552_v62, %v2552_v62  ;;  %v4799_v10 = vpack.c.bf16 %v2680_v63, %v2680_v63  ;;  %v1554_v11 = vpop.f32.mrf.mxu0  ;;  %v2066_v12 = vpop.f32.mrf.mxu1 }
  0xef   : > { %v4669_v14 = vpack.c.bf16 %v2550_v4, %v2550_v4  ;;  %v2553_v16 = vmax.f32 %v1563_v6, 0.0  ;;  %v2681_v17 = vmax.f32 %v2075_v7, 0.0  ;;  %v1555_v18 = vadd.f32 %v5708_v44, %v1554_v11  ;;  %v5440_v11 = vld [vmem:[%s5503_s22 + $0x1d8] sm:$0xff]  }
  0xf0   : > { %v4797_v15 = vpack.c.bf16 %v2678_v5, %v2678_v5  ;;  %3833 = vst.msk [vmem:[%s5723_s27 + $0x28] sm:$0xf] %vm3822_vm3, %v4671_v9  ;;  %3961 = vst.msk [vmem:[%s5723_s27 + $0x228] sm:$0xf] %vm3822_vm3, %v4799_v10  ;;  %v2067_v19 = vadd.f32 %v5708_v44, %v2066_v12  ;;  %v5065_v20 = vpop.f32.mrf.mxu0  ;;  %5160 = vmatmul.mubr.msk.bf16.gmra.mxu0 %vm1093_vm2, %v5432_v2  ;;  %v5193_v21 = vpop.f32.mrf.mxu1  ;;  %5288 = vmatmul.mubr.msk.bf16.gmra.mxu1 %vm1093_vm2, %v5433_v3  ;;  %v5441_v12 = vld [vmem:[%s5503_s22 + $0x3d8] sm:$0xff]  }
  0xf1   : > { %3831 = vst.msk [vmem:[%s5723_s27 + $0x20] sm:$0xf] %vm3822_vm3, %v4669_v14  ;;  %v4672_v22 = vpack.c.bf16 %v2553_v16, %v2553_v16  ;;  %v4800_v23 = vpack.c.bf16 %v2681_v17, %v2681_v17  ;;  %v1576_v24 = vadd.f32 %v5065_v20, %v5708_v44  ;;  %v2088_v25 = vadd.f32 %v5193_v21, %v5708_v44  ;;  %v5442_v17 = vld [vmem:[%s5503_s22 + $0x1e0] sm:$0xff]  }
  0xf2   : > { %3959 = vst.msk [vmem:[%s5723_s27 + $0x220] sm:$0xf] %vm3822_vm3, %v4797_v15  ;;  %5163 = vmatprep.mubr.msk.bf16.mxu0 %vm1093_vm2, %v5434_v8  ;;  %v2551_v26 = vmax.f32 %v1555_v18, 0.0  ;;  %v2679_v27 = vmax.f32 %v2067_v19, 0.0  ;;  %v1567_v28 = vpop.f32.mrf.mxu0  ;;  %v2079_v29 = vpop.f32.mrf.mxu1  ;;  %5291 = vmatprep.mubr.msk.bf16.mxu1 %vm1093_vm2, %v5435_v13  ;;  %v5443_v18 = vld [vmem:[%s5503_s22 + $0x3e0] sm:$0xff]  }
  0xf3   : > { %3834 = vst.msk [vmem:[%s5723_s27 + $0x2c] sm:$0xf] %vm3822_vm3, %v4672_v22  ;;  %3962 = vst.msk [vmem:[%s5723_s27 + $0x22c] sm:$0xf] %vm3822_vm3, %v4800_v23  ;;  %v2556_v30 = vmax.f32 %v1576_v24, 0.0  ;;  %v2684_v31 = vmax.f32 %v2088_v25, 0.0  ;;  %v1568_v32 = vadd.f32 %v5708_v44, %v1567_v28  ;;  %v2080_v33 = vadd.f32 %v5708_v44, %v2079_v29 }
  0xf4   : > { %v4670_v34 = vpack.c.bf16 %v2551_v26, %v2551_v26  ;;  %v4798_v35 = vpack.c.bf16 %v2679_v27, %v2679_v27  ;;  %v5066_v36 = vpop.f32.mrf.mxu0  ;;  %v5194_v37 = vpop.f32.mrf.mxu1 }
  0xf5   : > { %v4675_v40 = vpack.c.bf16 %v2556_v30, %v2556_v30  ;;  %v4803_v41 = vpack.c.bf16 %v2684_v31, %v2684_v31  ;;  %v2554_v42 = vmax.f32 %v1568_v32, 0.0  ;;  %v2682_v43 = vmax.f32 %v2080_v33, 0.0 }
  0xf6   : > { %3832 = vst.msk [vmem:[%s5723_s27 + $0x24] sm:$0xf] %vm3822_vm3, %v4670_v34  ;;  %3960 = vst.msk [vmem:[%s5723_s27 + $0x224] sm:$0xf] %vm3822_vm3, %v4798_v35  ;;  %v1579_v47 = vadd.f32 %v5066_v36, %v5708_v44  ;;  %v2091_v48 = vadd.f32 %v5194_v37, %v5708_v44  ;;  %v1570_v49 = vpop.f32.mrf.mxu0  ;;  %v2082_v50 = vpop.f32.mrf.mxu1 }
  0xf7   : > { %3837 = vst.msk [vmem:[%s5723_s27 + $0x38] sm:$0xf] %vm3822_vm3, %v4675_v40  ;;  %3965 = vst.msk [vmem:[%s5723_s27 + $0x238] sm:$0xf] %vm3822_vm3, %v4803_v41  ;;  %v4673_v51 = vpack.c.bf16 %v2554_v42, %v2554_v42  ;;  %v4801_v52 = vpack.c.bf16 %v2682_v43, %v2682_v43  ;;  %v1571_v53 = vadd.f32 %v5708_v44, %v1570_v49  ;;  %v5445_v49 = vld [vmem:[%s5503_s22 + $0x3e8] sm:$0xff]  }
  0xf8   : > { %v2083_v54 = vadd.f32 %v5708_v44, %v2082_v50  ;;  %v2557_v55 = vmax.f32 %v1579_v47, 0.0  ;;  %v2685_v56 = vmax.f32 %v2091_v48, 0.0  ;;  %v5069_v57 = vpop.f32.mrf.mxu0  ;;  %5164 = vmatmul.mubr.msk.bf16.gmra.mxu0 %vm1093_vm2, %v5436_v38  ;;  %v5197_v58 = vpop.f32.mrf.mxu1  ;;  %5292 = vmatmul.mubr.msk.bf16.gmra.mxu1 %vm1093_vm2, %v5437_v39  ;;  %v5444_v48 = vld [vmem:[%s5503_s22 + $0x1e8] sm:$0xff]  }
  0xf9   : > { %3835 = vst.msk [vmem:[%s5723_s27 + $0x30] sm:$0xf] %vm3822_vm3, %v4673_v51  ;;  %3963 = vst.msk [vmem:[%s5723_s27 + $0x230] sm:$0xf] %vm3822_vm3, %v4801_v52  ;;  %v2555_v59 = vmax.f32 %v1571_v53, 0.0  ;;  %v1592_v61 = vadd.f32 %v5069_v57, %v5708_v44  ;;  %v2104_v62 = vadd.f32 %v5197_v58, %v5708_v44  ;;  %5167 = vmatprep.mubr.msk.bf16.mxu0 %vm1093_vm2, %v5438_v45  ;;  %5295 = vmatprep.mubr.msk.bf16.mxu1 %vm1093_vm2, %v5439_v46 }
  0xfa   : > { %v2683_v60 = vmax.f32 %v2083_v54, 0.0  ;;  %v4676_v63 = vpack.c.bf16 %v2557_v55, %v2557_v55  ;;  %v4804_v0 = vpack.c.bf16 %v2685_v56, %v2685_v56  ;;  %v1583_v1 = vpop.f32.mrf.mxu0  ;;  %v2095_v2 = vpop.f32.mrf.mxu1  ;;  %v5446_v54 = vld [vmem:[%s5503_s22 + $0x1f0] sm:$0xff]  }
  0xfb   : > { %v4674_v3 = vpack.c.bf16 %v2555_v59, %v2555_v59  ;;  %v2560_v5 = vmax.f32 %v1592_v61, 0.0  ;;  %v2688_v6 = vmax.f32 %v2104_v62, 0.0  ;;  %v1584_v7 = vadd.f32 %v5708_v44, %v1583_v1  ;;  %v5447_v59 = vld [vmem:[%s5503_s22 + $0x3f0] sm:$0xff]  }
  0xfc   : > { %v4802_v4 = vpack.c.bf16 %v2683_v60, %v2683_v60  ;;  %3838 = vst.msk [vmem:[%s5723_s27 + $0x3c] sm:$0xf] %vm3822_vm3, %v4676_v63  ;;  %3966 = vst.msk [vmem:[%s5723_s27 + $0x23c] sm:$0xf] %vm3822_vm3, %v4804_v0  ;;  %v2096_v8 = vadd.f32 %v5708_v44, %v2095_v2  ;;  %v5070_v9 = vpop.f32.mrf.mxu0  ;;  %v5198_v10 = vpop.f32.mrf.mxu1 }
  0xfd   : > { %3836 = vst.msk [vmem:[%s5723_s27 + $0x34] sm:$0xf] %vm3822_vm3, %v4674_v3  ;;  %v4679_v13 = vpack.c.bf16 %v2560_v5, %v2560_v5  ;;  %v4807_v14 = vpack.c.bf16 %v2688_v6, %v2688_v6  ;;  %v1595_v15 = vadd.f32 %v5070_v9, %v5708_v44  ;;  %v2107_v16 = vadd.f32 %v5198_v10, %v5708_v44 }
  0xfe   : > { %3964 = vst.msk [vmem:[%s5723_s27 + $0x234] sm:$0xf] %vm3822_vm3, %v4802_v4  ;;  %v2558_v19 = vmax.f32 %v1584_v7, 0.0  ;;  %v2686_v20 = vmax.f32 %v2096_v8, 0.0  ;;  %v1586_v21 = vpop.f32.mrf.mxu0  ;;  %v2098_v22 = vpop.f32.mrf.mxu1 }
  0xff   : > { %3841 = vst.msk [vmem:[%s5723_s27 + $0x48] sm:$0xf] %vm3822_vm3, %v4679_v13  ;;  %3969 = vst.msk [vmem:[%s5723_s27 + $0x248] sm:$0xf] %vm3822_vm3, %v4807_v14  ;;  %v2561_v23 = vmax.f32 %v1595_v15, 0.0  ;;  %v2689_v24 = vmax.f32 %v2107_v16, 0.0  ;;  %v1587_v25 = vadd.f32 %v5708_v44, %v1586_v21  ;;  %v2099_v26 = vadd.f32 %v5708_v44, %v2098_v22 }
 0x100   : > { %v4677_v27 = vpack.c.bf16 %v2558_v19, %v2558_v19  ;;  %v4805_v28 = vpack.c.bf16 %v2686_v20, %v2686_v20  ;;  %v5073_v29 = vpop.f32.mrf.mxu0  ;;  %5168 = vmatmul.mubr.msk.bf16.gmra.mxu0 %vm1093_vm2, %v5440_v11  ;;  %v5201_v30 = vpop.f32.mrf.mxu1  ;;  %5296 = vmatmul.mubr.msk.bf16.gmra.mxu1 %vm1093_vm2, %v5441_v12  ;;  %v5448_v20 = vld [vmem:[%s5503_s22 + $0x1f8] sm:$0xff]  }
 0x101   : > { %v4680_v31 = vpack.c.bf16 %v2561_v23, %v2561_v23  ;;  %v4808_v32 = vpack.c.bf16 %v2689_v24, %v2689_v24  ;;  %v2559_v33 = vmax.f32 %v1587_v25, 0.0  ;;  %v2687_v34 = vmax.f32 %v2099_v26, 0.0  ;;  %5171 = vmatprep.mubr.msk.bf16.mxu0 %vm1093_vm2, %v5442_v17  ;;  %5299 = vmatprep.mubr.msk.bf16.mxu1 %vm1093_vm2, %v5443_v18  ;;  %v5449_v21 = vld [vmem:[%s5503_s22 + $0x3f8] sm:$0xff]  }
 0x102   : > { %3839 = vst.msk [vmem:[%s5723_s27 + $0x40] sm:$0xf] %vm3822_vm3, %v4677_v27  ;;  %3967 = vst.msk [vmem:[%s5723_s27 + $0x240] sm:$0xf] %vm3822_vm3, %v4805_v28  ;;  %v1608_v35 = vadd.f32 %v5073_v29, %v5708_v44  ;;  %v2120_v36 = vadd.f32 %v5201_v30, %v5708_v44  ;;  %v1599_v37 = vpop.f32.mrf.mxu0  ;;  %v2111_v38 = vpop.f32.mrf.mxu1 }
 0x103   : > { %3842 = vst.msk [vmem:[%s5723_s27 + $0x4c] sm:$0xf] %vm3822_vm3, %v4680_v31  ;;  %3970 = vst.msk [vmem:[%s5723_s27 + $0x24c] sm:$0xf] %vm3822_vm3, %v4808_v32  ;;  %v4678_v39 = vpack.c.bf16 %v2559_v33, %v2559_v33  ;;  %v4806_v40 = vpack.c.bf16 %v2687_v34, %v2687_v34  ;;  %v1600_v41 = vadd.f32 %v5708_v44, %v1599_v37 }
 0x104   : > { %v2112_v42 = vadd.f32 %v5708_v44, %v2111_v38  ;;  %v2564_v43 = vmax.f32 %v1608_v35, 0.0  ;;  %v2692_v45 = vmax.f32 %v2120_v36, 0.0  ;;  %v5074_v46 = vpop.f32.mrf.mxu0  ;;  %v5202_v47 = vpop.f32.mrf.mxu1 }
 0x105   : > { %3840 = vst.msk [vmem:[%s5723_s27 + $0x44] sm:$0xf] %vm3822_vm3, %v4678_v39  ;;  %3968 = vst.msk [vmem:[%s5723_s27 + $0x244] sm:$0xf] %vm3822_vm3, %v4806_v40  ;;  %v2562_v50 = vmax.f32 %v1600_v41, 0.0  ;;  %v1611_v52 = vadd.f32 %v5074_v46, %v5708_v44  ;;  %v2123_v53 = vadd.f32 %v5202_v47, %v5708_v44 }
 0x106   : > { %v2690_v51 = vmax.f32 %v2112_v42, 0.0  ;;  %v4683_v55 = vpack.c.bf16 %v2564_v43, %v2564_v43  ;;  %v4811_v56 = vpack.c.bf16 %v2692_v45, %v2692_v45  ;;  %v1602_v57 = vpop.f32.mrf.mxu0  ;;  %v2114_v58 = vpop.f32.mrf.mxu1 }
 0x107   : > { %v4681_v60 = vpack.c.bf16 %v2562_v50, %v2562_v50  ;;  %v2565_v62 = vmax.f32 %v1611_v52, 0.0  ;;  %v2693_v63 = vmax.f32 %v2123_v53, 0.0  ;;  %v1603_v0 = vadd.f32 %v5708_v44, %v1602_v57 }
 0x108   : > { %v4809_v61 = vpack.c.bf16 %v2690_v51, %v2690_v51  ;;  %3845 = vst.msk [vmem:[%s5723_s27 + $0x58] sm:$0xf] %vm3822_vm3, %v4683_v55  ;;  %3973 = vst.msk [vmem:[%s5723_s27 + $0x258] sm:$0xf] %vm3822_vm3, %v4811_v56  ;;  %v2115_v1 = vadd.f32 %v5708_v44, %v2114_v58  ;;  %v5077_v2 = vpop.f32.mrf.mxu0  ;;  %5172 = vmatmul.mubr.msk.bf16.gmra.mxu0 %vm1093_vm2, %v5444_v48  ;;  %v5205_v3 = vpop.f32.mrf.mxu1  ;;  %5300 = vmatmul.mubr.msk.bf16.gmra.mxu1 %vm1093_vm2, %v5445_v49 }
 0x109   : > { %3843 = vst.msk [vmem:[%s5723_s27 + $0x50] sm:$0xf] %vm3822_vm3, %v4681_v60  ;;  %v4684_v4 = vpack.c.bf16 %v2565_v62, %v2565_v62  ;;  %v4812_v5 = vpack.c.bf16 %v2693_v63, %v2693_v63  ;;  %v1624_v6 = vadd.f32 %v5077_v2, %v5708_v44  ;;  %v2136_v7 = vadd.f32 %v5205_v3, %v5708_v44 }
 0x10a   : > { %3971 = vst.msk [vmem:[%s5723_s27 + $0x250] sm:$0xf] %vm3822_vm3, %v4809_v61  ;;  %5175 = vmatprep.mubr.msk.bf16.mxu0 %vm1093_vm2, %v5446_v54  ;;  %v2563_v8 = vmax.f32 %v1603_v0, 0.0  ;;  %v2691_v9 = vmax.f32 %v2115_v1, 0.0  ;;  %v1615_v10 = vpop.f32.mrf.mxu0  ;;  %v2127_v11 = vpop.f32.mrf.mxu1  ;;  %5303 = vmatprep.mubr.msk.bf16.mxu1 %vm1093_vm2, %v5447_v59 }
 0x10b   : > { %3846 = vst.msk [vmem:[%s5723_s27 + $0x5c] sm:$0xf] %vm3822_vm3, %v4684_v4  ;;  %3974 = vst.msk [vmem:[%s5723_s27 + $0x25c] sm:$0xf] %vm3822_vm3, %v4812_v5  ;;  %v2568_v12 = vmax.f32 %v1624_v6, 0.0  ;;  %v2696_v13 = vmax.f32 %v2136_v7, 0.0  ;;  %v1616_v14 = vadd.f32 %v5708_v44, %v1615_v10  ;;  %v2128_v15 = vadd.f32 %v5708_v44, %v2127_v11 }
 0x10c   : > { %v4682_v16 = vpack.c.bf16 %v2563_v8, %v2563_v8  ;;  %v4810_v17 = vpack.c.bf16 %v2691_v9, %v2691_v9  ;;  %v5078_v18 = vpop.f32.mrf.mxu0  ;;  %v5206_v19 = vpop.f32.mrf.mxu1 }
 0x10d   : > { %v4687_v22 = vpack.c.bf16 %v2568_v12, %v2568_v12  ;;  %v4815_v23 = vpack.c.bf16 %v2696_v13, %v2696_v13  ;;  %v2566_v24 = vmax.f32 %v1616_v14, 0.0  ;;  %v2694_v25 = vmax.f32 %v2128_v15, 0.0 }
 0x10e   : > { %3844 = vst.msk [vmem:[%s5723_s27 + $0x54] sm:$0xf] %vm3822_vm3, %v4682_v16  ;;  %3972 = vst.msk [vmem:[%s5723_s27 + $0x254] sm:$0xf] %vm3822_vm3, %v4810_v17  ;;  %v1627_v26 = vadd.f32 %v5078_v18, %v5708_v44  ;;  %v2139_v27 = vadd.f32 %v5206_v19, %v5708_v44  ;;  %v1618_v28 = vpop.f32.mrf.mxu0  ;;  %v2130_v29 = vpop.f32.mrf.mxu1 }
 0x10f   : > { %3849 = vst.msk [vmem:[%s5723_s27 + $0x68] sm:$0xf] %vm3822_vm3, %v4687_v22  ;;  %3977 = vst.msk [vmem:[%s5723_s27 + $0x268] sm:$0xf] %vm3822_vm3, %v4815_v23  ;;  %v4685_v30 = vpack.c.bf16 %v2566_v24, %v2566_v24  ;;  %v4813_v31 = vpack.c.bf16 %v2694_v25, %v2694_v25  ;;  %v1619_v32 = vadd.f32 %v5708_v44, %v1618_v28 }
 0x110   : > { %v2131_v33 = vadd.f32 %v5708_v44, %v2130_v29  ;;  %v2569_v34 = vmax.f32 %v1627_v26, 0.0  ;;  %v2697_v35 = vmax.f32 %v2139_v27, 0.0  ;;  %v5081_v36 = vpop.f32.mrf.mxu0  ;;  %5176 = vmatmul.mubr.msk.bf16.gmra.mxu0 %vm1093_vm2, %v5448_v20  ;;  %v5209_v37 = vpop.f32.mrf.mxu1  ;;  %5304 = vmatmul.mubr.msk.bf16.gmra.mxu1 %vm1093_vm2, %v5449_v21 }
 0x111   : > { %3847 = vst.msk [vmem:[%s5723_s27 + $0x60] sm:$0xf] %vm3822_vm3, %v4685_v30  ;;  %3975 = vst.msk [vmem:[%s5723_s27 + $0x260] sm:$0xf] %vm3822_vm3, %v4813_v31  ;;  %v2567_v38 = vmax.f32 %v1619_v32, 0.0  ;;  %v1640_v40 = vadd.f32 %v5081_v36, %v5708_v44  ;;  %v2152_v41 = vadd.f32 %v5209_v37, %v5708_v44 }
 0x112   : > { %v2695_v39 = vmax.f32 %v2131_v33, 0.0  ;;  %v4688_v42 = vpack.c.bf16 %v2569_v34, %v2569_v34  ;;  %v4816_v43 = vpack.c.bf16 %v2697_v35, %v2697_v35  ;;  %v1631_v45 = vpop.f32.mrf.mxu0  ;;  %v2143_v46 = vpop.f32.mrf.mxu1 }
 0x113   : > { %v4686_v47 = vpack.c.bf16 %v2567_v38, %v2567_v38  ;;  %v2572_v49 = vmax.f32 %v1640_v40, 0.0  ;;  %v2700_v50 = vmax.f32 %v2152_v41, 0.0  ;;  %v1632_v51 = vadd.f32 %v5708_v44, %v1631_v45 }
 0x114   : > { %v4814_v48 = vpack.c.bf16 %v2695_v39, %v2695_v39  ;;  %3850 = vst.msk [vmem:[%s5723_s27 + $0x6c] sm:$0xf] %vm3822_vm3, %v4688_v42  ;;  %3978 = vst.msk [vmem:[%s5723_s27 + $0x26c] sm:$0xf] %vm3822_vm3, %v4816_v43  ;;  %v2144_v52 = vadd.f32 %v5708_v44, %v2143_v46  ;;  %v5082_v53 = vpop.f32.mrf.mxu0  ;;  %v5210_v54 = vpop.f32.mrf.mxu1 }
 0x115   : > { %3848 = vst.msk [vmem:[%s5723_s27 + $0x64] sm:$0xf] %vm3822_vm3, %v4686_v47  ;;  %v4691_v55 = vpack.c.bf16 %v2572_v49, %v2572_v49  ;;  %v4819_v56 = vpack.c.bf16 %v2700_v50, %v2700_v50  ;;  %v1643_v57 = vadd.f32 %v5082_v53, %v5708_v44  ;;  %v2155_v58 = vadd.f32 %v5210_v54, %v5708_v44 }
 0x116   : > { %3976 = vst.msk [vmem:[%s5723_s27 + $0x264] sm:$0xf] %vm3822_vm3, %v4814_v48  ;;  %v2570_v59 = vmax.f32 %v1632_v51, 0.0  ;;  %v2698_v60 = vmax.f32 %v2144_v52, 0.0  ;;  %v1634_v61 = vpop.f32.mrf.mxu0  ;;  %v2146_v62 = vpop.f32.mrf.mxu1 }
 0x117   : > { %3853 = vst.msk [vmem:[%s5723_s27 + $0x78] sm:$0xf] %vm3822_vm3, %v4691_v55  ;;  %3981 = vst.msk [vmem:[%s5723_s27 + $0x278] sm:$0xf] %vm3822_vm3, %v4819_v56  ;;  %v2573_v63 = vmax.f32 %v1643_v57, 0.0  ;;  %v2701_v0 = vmax.f32 %v2155_v58, 0.0  ;;  %v1635_v1 = vadd.f32 %v5708_v44, %v1634_v61  ;;  %v2147_v2 = vadd.f32 %v5708_v44, %v2146_v62 }
 0x118   : > { %v4689_v3 = vpack.c.bf16 %v2570_v59, %v2570_v59  ;;  %v4817_v4 = vpack.c.bf16 %v2698_v60, %v2698_v60  ;;  %v5085_v5 = vpop.f32.mrf.mxu0  ;;  %v5213_v6 = vpop.f32.mrf.mxu1 }
 0x119   : > { %v4692_v7 = vpack.c.bf16 %v2573_v63, %v2573_v63  ;;  %v4820_v8 = vpack.c.bf16 %v2701_v0, %v2701_v0  ;;  %v2571_v9 = vmax.f32 %v1635_v1, 0.0  ;;  %v2699_v10 = vmax.f32 %v2147_v2, 0.0 }
 0x11a   : > { %3851 = vst.msk [vmem:[%s5723_s27 + $0x70] sm:$0xf] %vm3822_vm3, %v4689_v3  ;;  %3979 = vst.msk [vmem:[%s5723_s27 + $0x270] sm:$0xf] %vm3822_vm3, %v4817_v4  ;;  %v1656_v11 = vadd.f32 %v5085_v5, %v5708_v44  ;;  %v2168_v12 = vadd.f32 %v5213_v6, %v5708_v44  ;;  %v1647_v13 = vpop.f32.mrf.mxu0  ;;  %v2159_v14 = vpop.f32.mrf.mxu1 }
 0x11b   : > { %3854 = vst.msk [vmem:[%s5723_s27 + $0x7c] sm:$0xf] %vm3822_vm3, %v4692_v7  ;;  %3982 = vst.msk [vmem:[%s5723_s27 + $0x27c] sm:$0xf] %vm3822_vm3, %v4820_v8  ;;  %v4690_v15 = vpack.c.bf16 %v2571_v9, %v2571_v9  ;;  %v4818_v16 = vpack.c.bf16 %v2699_v10, %v2699_v10  ;;  %v1648_v17 = vadd.f32 %v5708_v44, %v1647_v13 }
 0x11c   : > { %v2160_v18 = vadd.f32 %v5708_v44, %v2159_v14  ;;  %v2576_v19 = vmax.f32 %v1656_v11, 0.0  ;;  %v2704_v20 = vmax.f32 %v2168_v12, 0.0  ;;  %v5086_v21 = vpop.f32.mrf.mxu0  ;;  %v5214_v22 = vpop.f32.mrf.mxu1 }
 0x11d   : > { %3852 = vst.msk [vmem:[%s5723_s27 + $0x74] sm:$0xf] %vm3822_vm3, %v4690_v15  ;;  %3980 = vst.msk [vmem:[%s5723_s27 + $0x274] sm:$0xf] %vm3822_vm3, %v4818_v16  ;;  %v2574_v23 = vmax.f32 %v1648_v17, 0.0  ;;  %v1659_v25 = vadd.f32 %v5086_v21, %v5708_v44  ;;  %v2171_v26 = vadd.f32 %v5214_v22, %v5708_v44 }
 0x11e   : > { %v2702_v24 = vmax.f32 %v2160_v18, 0.0  ;;  %v4695_v27 = vpack.c.bf16 %v2576_v19, %v2576_v19  ;;  %v4823_v28 = vpack.c.bf16 %v2704_v20, %v2704_v20  ;;  %v1650_v29 = vpop.f32.mrf.mxu0  ;;  %v2162_v30 = vpop.f32.mrf.mxu1 }
 0x11f   : > { %v4693_v31 = vpack.c.bf16 %v2574_v23, %v2574_v23  ;;  %v2577_v33 = vmax.f32 %v1659_v25, 0.0  ;;  %v2705_v34 = vmax.f32 %v2171_v26, 0.0  ;;  %v1651_v35 = vadd.f32 %v5708_v44, %v1650_v29 }
 0x120   : > { %v4821_v32 = vpack.c.bf16 %v2702_v24, %v2702_v24  ;;  %3857 = vst.msk [vmem:[%s5723_s27 + $0x88] sm:$0xf] %vm3822_vm3, %v4695_v27  ;;  %3985 = vst.msk [vmem:[%s5723_s27 + $0x288] sm:$0xf] %vm3822_vm3, %v4823_v28  ;;  %v2163_v36 = vadd.f32 %v5708_v44, %v2162_v30  ;;  %v5089_v37 = vpop.f32.mrf.mxu0  ;;  %v5217_v38 = vpop.f32.mrf.mxu1 }
 0x121   : > { %3855 = vst.msk [vmem:[%s5723_s27 + $0x80] sm:$0xf] %vm3822_vm3, %v4693_v31  ;;  %v4696_v39 = vpack.c.bf16 %v2577_v33, %v2577_v33  ;;  %v4824_v40 = vpack.c.bf16 %v2705_v34, %v2705_v34  ;;  %v1672_v41 = vadd.f32 %v5089_v37, %v5708_v44  ;;  %v2184_v42 = vadd.f32 %v5217_v38, %v5708_v44 }
 0x122   : > { %3983 = vst.msk [vmem:[%s5723_s27 + $0x280] sm:$0xf] %vm3822_vm3, %v4821_v32  ;;  %v2575_v43 = vmax.f32 %v1651_v35, 0.0  ;;  %v2703_v45 = vmax.f32 %v2163_v36, 0.0  ;;  %v1663_v46 = vpop.f32.mrf.mxu0  ;;  %v2175_v47 = vpop.f32.mrf.mxu1 }
 0x123   : > { %3858 = vst.msk [vmem:[%s5723_s27 + $0x8c] sm:$0xf] %vm3822_vm3, %v4696_v39  ;;  %3986 = vst.msk [vmem:[%s5723_s27 + $0x28c] sm:$0xf] %vm3822_vm3, %v4824_v40  ;;  %v2580_v48 = vmax.f32 %v1672_v41, 0.0  ;;  %v2708_v49 = vmax.f32 %v2184_v42, 0.0  ;;  %v1664_v50 = vadd.f32 %v5708_v44, %v1663_v46  ;;  %v2176_v51 = vadd.f32 %v5708_v44, %v2175_v47 }
 0x124   : > { %v4694_v52 = vpack.c.bf16 %v2575_v43, %v2575_v43  ;;  %v4822_v53 = vpack.c.bf16 %v2703_v45, %v2703_v45  ;;  %v5090_v54 = vpop.f32.mrf.mxu0  ;;  %v5218_v55 = vpop.f32.mrf.mxu1 }
 0x125   : > { %v4699_v56 = vpack.c.bf16 %v2580_v48, %v2580_v48  ;;  %v4827_v57 = vpack.c.bf16 %v2708_v49, %v2708_v49  ;;  %v2578_v58 = vmax.f32 %v1664_v50, 0.0  ;;  %v2706_v59 = vmax.f32 %v2176_v51, 0.0 }
 0x126   : > { %3856 = vst.msk [vmem:[%s5723_s27 + $0x84] sm:$0xf] %vm3822_vm3, %v4694_v52  ;;  %3984 = vst.msk [vmem:[%s5723_s27 + $0x284] sm:$0xf] %vm3822_vm3, %v4822_v53  ;;  %v1675_v60 = vadd.f32 %v5090_v54, %v5708_v44  ;;  %v2187_v61 = vadd.f32 %v5218_v55, %v5708_v44  ;;  %v1666_v62 = vpop.f32.mrf.mxu0  ;;  %v2178_v63 = vpop.f32.mrf.mxu1 }
 0x127   : > { %3861 = vst.msk [vmem:[%s5723_s27 + $0x98] sm:$0xf] %vm3822_vm3, %v4699_v56  ;;  %3989 = vst.msk [vmem:[%s5723_s27 + $0x298] sm:$0xf] %vm3822_vm3, %v4827_v57  ;;  %v4697_v0 = vpack.c.bf16 %v2578_v58, %v2578_v58  ;;  %v4825_v1 = vpack.c.bf16 %v2706_v59, %v2706_v59  ;;  %v1667_v2 = vadd.f32 %v5708_v44, %v1666_v62  ;;  %v6044_v59 = vld [vmem:[%s6556_s2] ss:$0 sm:$0xff] }
 0x128   : > { %v2179_v3 = vadd.f32 %v5708_v44, %v2178_v63  ;;  %v2581_v4 = vmax.f32 %v1675_v60, 0.0  ;;  %v2709_v5 = vmax.f32 %v2187_v61, 0.0  ;;  %v5093_v6 = vpop.f32.mrf.mxu0  ;;  %v5221_v7 = vpop.f32.mrf.mxu1 }
 0x129   : > { %3859 = vst.msk [vmem:[%s5723_s27 + $0x90] sm:$0xf] %vm3822_vm3, %v4697_v0  ;;  %3987 = vst.msk [vmem:[%s5723_s27 + $0x290] sm:$0xf] %vm3822_vm3, %v4825_v1  ;;  %v2579_v8 = vmax.f32 %v1667_v2, 0.0  ;;  %v1688_v10 = vadd.f32 %v5093_v6, %v5708_v44  ;;  %v2200_v11 = vadd.f32 %v5221_v7, %v5708_v44 }
 0x12a   : > { %v2707_v9 = vmax.f32 %v2179_v3, 0.0  ;;  %v4700_v12 = vpack.c.bf16 %v2581_v4, %v2581_v4  ;;  %v4828_v13 = vpack.c.bf16 %v2709_v5, %v2709_v5  ;;  %v1679_v14 = vpop.f32.mrf.mxu0  ;;  %v2191_v15 = vpop.f32.mrf.mxu1 }
 0x12b   : > { %v4698_v16 = vpack.c.bf16 %v2579_v8, %v2579_v8  ;;  %v2584_v18 = vmax.f32 %v1688_v10, 0.0  ;;  %v2712_v19 = vmax.f32 %v2200_v11, 0.0  ;;  %v1680_v20 = vadd.f32 %v5708_v44, %v1679_v14 }
 0x12c   : > { %v4826_v17 = vpack.c.bf16 %v2707_v9, %v2707_v9  ;;  %3862 = vst.msk [vmem:[%s5723_s27 + $0x9c] sm:$0xf] %vm3822_vm3, %v4700_v12  ;;  %3990 = vst.msk [vmem:[%s5723_s27 + $0x29c] sm:$0xf] %vm3822_vm3, %v4828_v13  ;;  %v2192_v21 = vadd.f32 %v5708_v44, %v2191_v15  ;;  %v5094_v22 = vpop.f32.mrf.mxu0  ;;  %v5222_v23 = vpop.f32.mrf.mxu1 }
 0x12d   : > { %3860 = vst.msk [vmem:[%s5723_s27 + $0x94] sm:$0xf] %vm3822_vm3, %v4698_v16  ;;  %v4703_v24 = vpack.c.bf16 %v2584_v18, %v2584_v18  ;;  %v4831_v25 = vpack.c.bf16 %v2712_v19, %v2712_v19  ;;  %v1691_v26 = vadd.f32 %v5094_v22, %v5708_v44  ;;  %v2203_v27 = vadd.f32 %v5222_v23, %v5708_v44 }
 0x12e   : > { %3988 = vst.msk [vmem:[%s5723_s27 + $0x294] sm:$0xf] %vm3822_vm3, %v4826_v17  ;;  %v2582_v28 = vmax.f32 %v1680_v20, 0.0  ;;  %v2710_v29 = vmax.f32 %v2192_v21, 0.0  ;;  %v1682_v30 = vpop.f32.mrf.mxu0  ;;  %v2194_v31 = vpop.f32.mrf.mxu1 }
 0x12f   : > { %3865 = vst.msk [vmem:[%s5723_s27 + $0xa8] sm:$0xf] %vm3822_vm3, %v4703_v24  ;;  %3993 = vst.msk [vmem:[%s5723_s27 + $0x2a8] sm:$0xf] %vm3822_vm3, %v4831_v25  ;;  %v2585_v32 = vmax.f32 %v1691_v26, 0.0  ;;  %v2713_v33 = vmax.f32 %v2203_v27, 0.0  ;;  %v1683_v34 = vadd.f32 %v5708_v44, %v1682_v30  ;;  %v2195_v35 = vadd.f32 %v5708_v44, %v2194_v31 }
 0x130   : > { %v4701_v36 = vpack.c.bf16 %v2582_v28, %v2582_v28  ;;  %v4829_v37 = vpack.c.bf16 %v2710_v29, %v2710_v29  ;;  %v5097_v38 = vpop.f32.mrf.mxu0  ;;  %v5225_v39 = vpop.f32.mrf.mxu1 }
 0x131   : > { %v4704_v40 = vpack.c.bf16 %v2585_v32, %v2585_v32  ;;  %v4832_v41 = vpack.c.bf16 %v2713_v33, %v2713_v33  ;;  %v2583_v42 = vmax.f32 %v1683_v34, 0.0  ;;  %v2711_v43 = vmax.f32 %v2195_v35, 0.0 }
 0x132   : > { %3863 = vst.msk [vmem:[%s5723_s27 + $0xa0] sm:$0xf] %vm3822_vm3, %v4701_v36  ;;  %3991 = vst.msk [vmem:[%s5723_s27 + $0x2a0] sm:$0xf] %vm3822_vm3, %v4829_v37  ;;  %v1704_v45 = vadd.f32 %v5097_v38, %v5708_v44  ;;  %v2216_v46 = vadd.f32 %v5225_v39, %v5708_v44  ;;  %v1695_v47 = vpop.f32.mrf.mxu0  ;;  %v2207_v48 = vpop.f32.mrf.mxu1 }
 0x133   : > { %3866 = vst.msk [vmem:[%s5723_s27 + $0xac] sm:$0xf] %vm3822_vm3, %v4704_v40  ;;  %3994 = vst.msk [vmem:[%s5723_s27 + $0x2ac] sm:$0xf] %vm3822_vm3, %v4832_v41  ;;  %v4702_v49 = vpack.c.bf16 %v2583_v42, %v2583_v42  ;;  %v4830_v50 = vpack.c.bf16 %v2711_v43, %v2711_v43  ;;  %v1696_v51 = vadd.f32 %v5708_v44, %v1695_v47 }
 0x134   : > { %v2208_v52 = vadd.f32 %v5708_v44, %v2207_v48  ;;  %v2588_v53 = vmax.f32 %v1704_v45, 0.0  ;;  %v2716_v54 = vmax.f32 %v2216_v46, 0.0  ;;  %v5098_v55 = vpop.f32.mrf.mxu0  ;;  %v5226_v56 = vpop.f32.mrf.mxu1 }
 0x135   : > { %3864 = vst.msk [vmem:[%s5723_s27 + $0xa4] sm:$0xf] %vm3822_vm3, %v4702_v49  ;;  %3992 = vst.msk [vmem:[%s5723_s27 + $0x2a4] sm:$0xf] %vm3822_vm3, %v4830_v50  ;;  %v2586_v57 = vmax.f32 %v1696_v51, 0.0  ;;  %v1707_v60 = vadd.f32 %v6044_v59, %v5098_v55  ;;  %v2219_v44 = vadd.f32 %v6044_v59, %v5226_v56 }
 0x136   : > { %v2714_v58 = vmax.f32 %v2208_v52, 0.0  ;;  %v4707_v61 = vpack.c.bf16 %v2588_v53, %v2588_v53  ;;  %v4835_v62 = vpack.c.bf16 %v2716_v54, %v2716_v54  ;;  %v1698_v63 = vpop.f32.mrf.mxu0  ;;  %v2210_v0 = vpop.f32.mrf.mxu1 }
 0x137   : > { %v4705_v1 = vpack.c.bf16 %v2586_v57, %v2586_v57  ;;  %v2589_v3 = vmax.f32 %v1707_v60, 0.0  ;;  %v2717_v4 = vmax.f32 %v2219_v44, 0.0  ;;  %v1699_v5 = vadd.f32 %v6044_v59, %v1698_v63 }
 0x138   : > { %v4833_v2 = vpack.c.bf16 %v2714_v58, %v2714_v58  ;;  %3869 = vst.msk [vmem:[%s5723_s27 + $0xb8] sm:$0xf] %vm3822_vm3, %v4707_v61  ;;  %3997 = vst.msk [vmem:[%s5723_s27 + $0x2b8] sm:$0xf] %vm3822_vm3, %v4835_v62  ;;  %v2211_v6 = vadd.f32 %v6044_v59, %v2210_v0  ;;  %v5101_v7 = vpop.f32.mrf.mxu0  ;;  %v5229_v8 = vpop.f32.mrf.mxu1 }
 0x139   : > { %3867 = vst.msk [vmem:[%s5723_s27 + $0xb0] sm:$0xf] %vm3822_vm3, %v4705_v1  ;;  %v4708_v9 = vpack.c.bf16 %v2589_v3, %v2589_v3  ;;  %v4836_v10 = vpack.c.bf16 %v2717_v4, %v2717_v4  ;;  %v1720_v11 = vadd.f32 %v6044_v59, %v5101_v7  ;;  %v2232_v12 = vadd.f32 %v6044_v59, %v5229_v8 }
 0x13a   : > { %3995 = vst.msk [vmem:[%s5723_s27 + $0x2b0] sm:$0xf] %vm3822_vm3, %v4833_v2  ;;  %v2587_v13 = vmax.f32 %v1699_v5, 0.0  ;;  %v2715_v14 = vmax.f32 %v2211_v6, 0.0  ;;  %v1711_v15 = vpop.f32.mrf.mxu0  ;;  %v2223_v16 = vpop.f32.mrf.mxu1 }
 0x13b   : > { %3870 = vst.msk [vmem:[%s5723_s27 + $0xbc] sm:$0xf] %vm3822_vm3, %v4708_v9  ;;  %3998 = vst.msk [vmem:[%s5723_s27 + $0x2bc] sm:$0xf] %vm3822_vm3, %v4836_v10  ;;  %v2592_v17 = vmax.f32 %v1720_v11, 0.0  ;;  %v2720_v18 = vmax.f32 %v2232_v12, 0.0  ;;  %v1712_v19 = vadd.f32 %v6044_v59, %v1711_v15  ;;  %v2224_v20 = vadd.f32 %v6044_v59, %v2223_v16 }
 0x13c   : > { %v4706_v21 = vpack.c.bf16 %v2587_v13, %v2587_v13  ;;  %v4834_v22 = vpack.c.bf16 %v2715_v14, %v2715_v14  ;;  %v5102_v23 = vpop.f32.mrf.mxu0  ;;  %v5230_v24 = vpop.f32.mrf.mxu1 }
 0x13d   : > { %v4711_v25 = vpack.c.bf16 %v2592_v17, %v2592_v17  ;;  %v4839_v26 = vpack.c.bf16 %v2720_v18, %v2720_v18  ;;  %v2590_v27 = vmax.f32 %v1712_v19, 0.0  ;;  %v2718_v28 = vmax.f32 %v2224_v20, 0.0 }
 0x13e   : > { %3868 = vst.msk [vmem:[%s5723_s27 + $0xb4] sm:$0xf] %vm3822_vm3, %v4706_v21  ;;  %3996 = vst.msk [vmem:[%s5723_s27 + $0x2b4] sm:$0xf] %vm3822_vm3, %v4834_v22  ;;  %v1723_v29 = vadd.f32 %v6044_v59, %v5102_v23  ;;  %v2235_v30 = vadd.f32 %v6044_v59, %v5230_v24  ;;  %v1714_v31 = vpop.f32.mrf.mxu0  ;;  %v2226_v32 = vpop.f32.mrf.mxu1 }
 0x13f   : > { %3873 = vst.msk [vmem:[%s5723_s27 + $0xc8] sm:$0xf] %vm3822_vm3, %v4711_v25  ;;  %4001 = vst.msk [vmem:[%s5723_s27 + $0x2c8] sm:$0xf] %vm3822_vm3, %v4839_v26  ;;  %v4709_v33 = vpack.c.bf16 %v2590_v27, %v2590_v27  ;;  %v4837_v34 = vpack.c.bf16 %v2718_v28, %v2718_v28  ;;  %v1715_v35 = vadd.f32 %v6044_v59, %v1714_v31 }
 0x140   : > { %v2227_v36 = vadd.f32 %v6044_v59, %v2226_v32  ;;  %v2593_v37 = vmax.f32 %v1723_v29, 0.0  ;;  %v2721_v38 = vmax.f32 %v2235_v30, 0.0  ;;  %v5105_v39 = vpop.f32.mrf.mxu0  ;;  %v5233_v40 = vpop.f32.mrf.mxu1 }
 0x141   : > { %3871 = vst.msk [vmem:[%s5723_s27 + $0xc0] sm:$0xf] %vm3822_vm3, %v4709_v33  ;;  %3999 = vst.msk [vmem:[%s5723_s27 + $0x2c0] sm:$0xf] %vm3822_vm3, %v4837_v34  ;;  %v2591_v41 = vmax.f32 %v1715_v35, 0.0  ;;  %v1736_v43 = vadd.f32 %v6044_v59, %v5105_v39  ;;  %v2248_v45 = vadd.f32 %v6044_v59, %v5233_v40 }
 0x142   : > { %v2719_v42 = vmax.f32 %v2227_v36, 0.0  ;;  %v4712_v46 = vpack.c.bf16 %v2593_v37, %v2593_v37  ;;  %v4840_v47 = vpack.c.bf16 %v2721_v38, %v2721_v38  ;;  %v1727_v48 = vpop.f32.mrf.mxu0  ;;  %v2239_v49 = vpop.f32.mrf.mxu1 }
 0x143   : > { %v4710_v50 = vpack.c.bf16 %v2591_v41, %v2591_v41  ;;  %v2596_v52 = vmax.f32 %v1736_v43, 0.0  ;;  %v2724_v53 = vmax.f32 %v2248_v45, 0.0  ;;  %v1728_v54 = vadd.f32 %v6044_v59, %v1727_v48 }
 0x144   : > { %v4838_v51 = vpack.c.bf16 %v2719_v42, %v2719_v42  ;;  %3874 = vst.msk [vmem:[%s5723_s27 + $0xcc] sm:$0xf] %vm3822_vm3, %v4712_v46  ;;  %4002 = vst.msk [vmem:[%s5723_s27 + $0x2cc] sm:$0xf] %vm3822_vm3, %v4840_v47  ;;  %v2240_v55 = vadd.f32 %v6044_v59, %v2239_v49  ;;  %v5106_v56 = vpop.f32.mrf.mxu0  ;;  %v5234_v57 = vpop.f32.mrf.mxu1 }
 0x145   : > { %3872 = vst.msk [vmem:[%s5723_s27 + $0xc4] sm:$0xf] %vm3822_vm3, %v4710_v50  ;;  %v4715_v58 = vpack.c.bf16 %v2596_v52, %v2596_v52  ;;  %v4843_v60 = vpack.c.bf16 %v2724_v53, %v2724_v53  ;;  %v1739_v44 = vadd.f32 %v6044_v59, %v5106_v56  ;;  %v2251_v61 = vadd.f32 %v6044_v59, %v5234_v57 }
 0x146   : > { %4000 = vst.msk [vmem:[%s5723_s27 + $0x2c4] sm:$0xf] %vm3822_vm3, %v4838_v51  ;;  %v2594_v62 = vmax.f32 %v1728_v54, 0.0  ;;  %v2722_v63 = vmax.f32 %v2240_v55, 0.0  ;;  %v1730_v0 = vpop.f32.mrf.mxu0  ;;  %v2242_v1 = vpop.f32.mrf.mxu1 }
 0x147   : > { %3877 = vst.msk [vmem:[%s5723_s27 + $0xd8] sm:$0xf] %vm3822_vm3, %v4715_v58  ;;  %4005 = vst.msk [vmem:[%s5723_s27 + $0x2d8] sm:$0xf] %vm3822_vm3, %v4843_v60  ;;  %v2597_v2 = vmax.f32 %v1739_v44, 0.0  ;;  %v2725_v3 = vmax.f32 %v2251_v61, 0.0  ;;  %v1731_v4 = vadd.f32 %v6044_v59, %v1730_v0  ;;  %v2243_v5 = vadd.f32 %v6044_v59, %v2242_v1 }
 0x148   : > { %v4713_v6 = vpack.c.bf16 %v2594_v62, %v2594_v62  ;;  %v4841_v7 = vpack.c.bf16 %v2722_v63, %v2722_v63  ;;  %v5109_v8 = vpop.f32.mrf.mxu0  ;;  %v5237_v9 = vpop.f32.mrf.mxu1 }
 0x149   : > { %v4716_v10 = vpack.c.bf16 %v2597_v2, %v2597_v2  ;;  %v4844_v11 = vpack.c.bf16 %v2725_v3, %v2725_v3  ;;  %v2595_v12 = vmax.f32 %v1731_v4, 0.0  ;;  %v2723_v13 = vmax.f32 %v2243_v5, 0.0 }
 0x14a   : > { %3875 = vst.msk [vmem:[%s5723_s27 + $0xd0] sm:$0xf] %vm3822_vm3, %v4713_v6  ;;  %4003 = vst.msk [vmem:[%s5723_s27 + $0x2d0] sm:$0xf] %vm3822_vm3, %v4841_v7  ;;  %v1752_v14 = vadd.f32 %v6044_v59, %v5109_v8  ;;  %v2264_v15 = vadd.f32 %v6044_v59, %v5237_v9  ;;  %v1743_v16 = vpop.f32.mrf.mxu0  ;;  %v2255_v17 = vpop.f32.mrf.mxu1 }
 0x14b   : > { %3878 = vst.msk [vmem:[%s5723_s27 + $0xdc] sm:$0xf] %vm3822_vm3, %v4716_v10  ;;  %4006 = vst.msk [vmem:[%s5723_s27 + $0x2dc] sm:$0xf] %vm3822_vm3, %v4844_v11  ;;  %v4714_v18 = vpack.c.bf16 %v2595_v12, %v2595_v12  ;;  %v4842_v19 = vpack.c.bf16 %v2723_v13, %v2723_v13  ;;  %v1744_v20 = vadd.f32 %v6044_v59, %v1743_v16 }
 0x14c   : > { %v2256_v21 = vadd.f32 %v6044_v59, %v2255_v17  ;;  %v2600_v22 = vmax.f32 %v1752_v14, 0.0  ;;  %v2728_v23 = vmax.f32 %v2264_v15, 0.0  ;;  %v5110_v24 = vpop.f32.mrf.mxu0  ;;  %v5238_v25 = vpop.f32.mrf.mxu1 }
 0x14d   : > { %3876 = vst.msk [vmem:[%s5723_s27 + $0xd4] sm:$0xf] %vm3822_vm3, %v4714_v18  ;;  %4004 = vst.msk [vmem:[%s5723_s27 + $0x2d4] sm:$0xf] %vm3822_vm3, %v4842_v19  ;;  %v2598_v26 = vmax.f32 %v1744_v20, 0.0  ;;  %v1755_v28 = vadd.f32 %v6044_v59, %v5110_v24  ;;  %v2267_v29 = vadd.f32 %v6044_v59, %v5238_v25 }
 0x14e   : > { %v2726_v27 = vmax.f32 %v2256_v21, 0.0  ;;  %v4719_v30 = vpack.c.bf16 %v2600_v22, %v2600_v22  ;;  %v4847_v31 = vpack.c.bf16 %v2728_v23, %v2728_v23  ;;  %v1746_v32 = vpop.f32.mrf.mxu0  ;;  %v2258_v33 = vpop.f32.mrf.mxu1 }
 0x14f   : > { %v4717_v34 = vpack.c.bf16 %v2598_v26, %v2598_v26  ;;  %v2601_v36 = vmax.f32 %v1755_v28, 0.0  ;;  %v2729_v37 = vmax.f32 %v2267_v29, 0.0  ;;  %v1747_v38 = vadd.f32 %v6044_v59, %v1746_v32 }
 0x150   : > { %v4845_v35 = vpack.c.bf16 %v2726_v27, %v2726_v27  ;;  %3881 = vst.msk [vmem:[%s5723_s27 + $0xe8] sm:$0xf] %vm3822_vm3, %v4719_v30  ;;  %4009 = vst.msk [vmem:[%s5723_s27 + $0x2e8] sm:$0xf] %vm3822_vm3, %v4847_v31  ;;  %v2259_v39 = vadd.f32 %v6044_v59, %v2258_v33  ;;  %v5113_v40 = vpop.f32.mrf.mxu0  ;;  %v5241_v41 = vpop.f32.mrf.mxu1 }
 0x151   : > { %3879 = vst.msk [vmem:[%s5723_s27 + $0xe0] sm:$0xf] %vm3822_vm3, %v4717_v34  ;;  %v4720_v42 = vpack.c.bf16 %v2601_v36, %v2601_v36  ;;  %v4848_v43 = vpack.c.bf16 %v2729_v37, %v2729_v37  ;;  %v1768_v45 = vadd.f32 %v6044_v59, %v5113_v40  ;;  %v2280_v46 = vadd.f32 %v6044_v59, %v5241_v41 }
 0x152   : > { %4007 = vst.msk [vmem:[%s5723_s27 + $0x2e0] sm:$0xf] %vm3822_vm3, %v4845_v35  ;;  %v2599_v47 = vmax.f32 %v1747_v38, 0.0  ;;  %v2727_v48 = vmax.f32 %v2259_v39, 0.0  ;;  %v1759_v49 = vpop.f32.mrf.mxu0  ;;  %v2271_v50 = vpop.f32.mrf.mxu1 }
 0x153   : > { %3882 = vst.msk [vmem:[%s5723_s27 + $0xec] sm:$0xf] %vm3822_vm3, %v4720_v42  ;;  %4010 = vst.msk [vmem:[%s5723_s27 + $0x2ec] sm:$0xf] %vm3822_vm3, %v4848_v43  ;;  %v2604_v51 = vmax.f32 %v1768_v45, 0.0  ;;  %v2732_v52 = vmax.f32 %v2280_v46, 0.0  ;;  %v1760_v53 = vadd.f32 %v6044_v59, %v1759_v49  ;;  %v2272_v54 = vadd.f32 %v6044_v59, %v2271_v50 }
 0x154   : > { %v4718_v55 = vpack.c.bf16 %v2599_v47, %v2599_v47  ;;  %v4846_v56 = vpack.c.bf16 %v2727_v48, %v2727_v48  ;;  %v5114_v57 = vpop.f32.mrf.mxu0  ;;  %v5242_v58 = vpop.f32.mrf.mxu1 }
 0x155   : > { %v4723_v60 = vpack.c.bf16 %v2604_v51, %v2604_v51  ;;  %v4851_v44 = vpack.c.bf16 %v2732_v52, %v2732_v52  ;;  %v2602_v61 = vmax.f32 %v1760_v53, 0.0  ;;  %v2730_v62 = vmax.f32 %v2272_v54, 0.0 }
 0x156   : > { %3880 = vst.msk [vmem:[%s5723_s27 + $0xe4] sm:$0xf] %vm3822_vm3, %v4718_v55  ;;  %4008 = vst.msk [vmem:[%s5723_s27 + $0x2e4] sm:$0xf] %vm3822_vm3, %v4846_v56  ;;  %v1771_v63 = vadd.f32 %v6044_v59, %v5114_v57  ;;  %v2283_v0 = vadd.f32 %v6044_v59, %v5242_v58  ;;  %v1762_v1 = vpop.f32.mrf.mxu0  ;;  %v2274_v2 = vpop.f32.mrf.mxu1 }
 0x157   : > { %3885 = vst.msk [vmem:[%s5723_s27 + $0xf8] sm:$0xf] %vm3822_vm3, %v4723_v60  ;;  %4013 = vst.msk [vmem:[%s5723_s27 + $0x2f8] sm:$0xf] %vm3822_vm3, %v4851_v44  ;;  %v4721_v3 = vpack.c.bf16 %v2602_v61, %v2602_v61  ;;  %v4849_v4 = vpack.c.bf16 %v2730_v62, %v2730_v62  ;;  %v1763_v5 = vadd.f32 %v6044_v59, %v1762_v1 }
 0x158   : > { %v2275_v6 = vadd.f32 %v6044_v59, %v2274_v2  ;;  %v2605_v7 = vmax.f32 %v1771_v63, 0.0  ;;  %v2733_v8 = vmax.f32 %v2283_v0, 0.0  ;;  %v5117_v9 = vpop.f32.mrf.mxu0  ;;  %v5245_v10 = vpop.f32.mrf.mxu1 }
 0x159   : > { %3883 = vst.msk [vmem:[%s5723_s27 + $0xf0] sm:$0xf] %vm3822_vm3, %v4721_v3  ;;  %4011 = vst.msk [vmem:[%s5723_s27 + $0x2f0] sm:$0xf] %vm3822_vm3, %v4849_v4  ;;  %v2603_v11 = vmax.f32 %v1763_v5, 0.0  ;;  %v1784_v13 = vadd.f32 %v6044_v59, %v5117_v9  ;;  %v2296_v14 = vadd.f32 %v6044_v59, %v5245_v10 }
 0x15a   : > { %v2731_v12 = vmax.f32 %v2275_v6, 0.0  ;;  %v4724_v15 = vpack.c.bf16 %v2605_v7, %v2605_v7  ;;  %v4852_v16 = vpack.c.bf16 %v2733_v8, %v2733_v8  ;;  %v1775_v17 = vpop.f32.mrf.mxu0  ;;  %v2287_v18 = vpop.f32.mrf.mxu1 }
 0x15b   : > { %v4722_v19 = vpack.c.bf16 %v2603_v11, %v2603_v11  ;;  %v2608_v21 = vmax.f32 %v1784_v13, 0.0  ;;  %v2736_v22 = vmax.f32 %v2296_v14, 0.0  ;;  %v1776_v23 = vadd.f32 %v6044_v59, %v1775_v17 }
 0x15c   : > { %v4850_v20 = vpack.c.bf16 %v2731_v12, %v2731_v12  ;;  %3886 = vst.msk [vmem:[%s5723_s27 + $0xfc] sm:$0xf] %vm3822_vm3, %v4724_v15  ;;  %4014 = vst.msk [vmem:[%s5723_s27 + $0x2fc] sm:$0xf] %vm3822_vm3, %v4852_v16  ;;  %v2288_v24 = vadd.f32 %v6044_v59, %v2287_v18  ;;  %v5118_v25 = vpop.f32.mrf.mxu0  ;;  %v5246_v26 = vpop.f32.mrf.mxu1 }
 0x15d   : > { %3884 = vst.msk [vmem:[%s5723_s27 + $0xf4] sm:$0xf] %vm3822_vm3, %v4722_v19  ;;  %v4727_v27 = vpack.c.bf16 %v2608_v21, %v2608_v21  ;;  %v4855_v28 = vpack.c.bf16 %v2736_v22, %v2736_v22  ;;  %v1787_v29 = vadd.f32 %v6044_v59, %v5118_v25  ;;  %v2299_v30 = vadd.f32 %v6044_v59, %v5246_v26 }
 0x15e   : > { %4012 = vst.msk [vmem:[%s5723_s27 + $0x2f4] sm:$0xf] %vm3822_vm3, %v4850_v20  ;;  %v2606_v31 = vmax.f32 %v1776_v23, 0.0  ;;  %v2734_v32 = vmax.f32 %v2288_v24, 0.0  ;;  %v1778_v33 = vpop.f32.mrf.mxu0  ;;  %v2290_v34 = vpop.f32.mrf.mxu1 }
 0x15f   : > { %3889 = vst.msk [vmem:[%s5723_s27 + $0x108] sm:$0xf] %vm3822_vm3, %v4727_v27  ;;  %4017 = vst.msk [vmem:[%s5723_s27 + $0x308] sm:$0xf] %vm3822_vm3, %v4855_v28  ;;  %v2609_v35 = vmax.f32 %v1787_v29, 0.0  ;;  %v2737_v36 = vmax.f32 %v2299_v30, 0.0  ;;  %v1779_v37 = vadd.f32 %v6044_v59, %v1778_v33  ;;  %v2291_v38 = vadd.f32 %v6044_v59, %v2290_v34 }
 0x160   : > { %v4725_v39 = vpack.c.bf16 %v2606_v31, %v2606_v31  ;;  %v4853_v40 = vpack.c.bf16 %v2734_v32, %v2734_v32  ;;  %v5121_v41 = vpop.f32.mrf.mxu0  ;;  %v5249_v42 = vpop.f32.mrf.mxu1 }
 0x161   : > { %v4728_v43 = vpack.c.bf16 %v2609_v35, %v2609_v35  ;;  %v4856_v45 = vpack.c.bf16 %v2737_v36, %v2737_v36  ;;  %v2607_v46 = vmax.f32 %v1779_v37, 0.0  ;;  %v2735_v47 = vmax.f32 %v2291_v38, 0.0 }
 0x162   : > { %3887 = vst.msk [vmem:[%s5723_s27 + $0x100] sm:$0xf] %vm3822_vm3, %v4725_v39  ;;  %4015 = vst.msk [vmem:[%s5723_s27 + $0x300] sm:$0xf] %vm3822_vm3, %v4853_v40  ;;  %v1800_v48 = vadd.f32 %v6044_v59, %v5121_v41  ;;  %v2312_v49 = vadd.f32 %v6044_v59, %v5249_v42  ;;  %v1791_v50 = vpop.f32.mrf.mxu0  ;;  %v2303_v51 = vpop.f32.mrf.mxu1 }
 0x163   : > { %3890 = vst.msk [vmem:[%s5723_s27 + $0x10c] sm:$0xf] %vm3822_vm3, %v4728_v43  ;;  %4018 = vst.msk [vmem:[%s5723_s27 + $0x30c] sm:$0xf] %vm3822_vm3, %v4856_v45  ;;  %v4726_v52 = vpack.c.bf16 %v2607_v46, %v2607_v46  ;;  %v4854_v53 = vpack.c.bf16 %v2735_v47, %v2735_v47  ;;  %v1792_v54 = vadd.f32 %v6044_v59, %v1791_v50 }
 0x164   : > { %v2304_v55 = vadd.f32 %v6044_v59, %v2303_v51  ;;  %v2612_v56 = vmax.f32 %v1800_v48, 0.0  ;;  %v2740_v57 = vmax.f32 %v2312_v49, 0.0  ;;  %v5122_v58 = vpop.f32.mrf.mxu0  ;;  %v5250_v60 = vpop.f32.mrf.mxu1 }
 0x165   : > { %3888 = vst.msk [vmem:[%s5723_s27 + $0x104] sm:$0xf] %vm3822_vm3, %v4726_v52  ;;  %4016 = vst.msk [vmem:[%s5723_s27 + $0x304] sm:$0xf] %vm3822_vm3, %v4854_v53  ;;  %v2610_v44 = vmax.f32 %v1792_v54, 0.0  ;;  %v1803_v62 = vadd.f32 %v6044_v59, %v5122_v58  ;;  %v2315_v63 = vadd.f32 %v6044_v59, %v5250_v60 }
 0x166   : > { %v2738_v61 = vmax.f32 %v2304_v55, 0.0  ;;  %v4731_v0 = vpack.c.bf16 %v2612_v56, %v2612_v56  ;;  %v4859_v1 = vpack.c.bf16 %v2740_v57, %v2740_v57  ;;  %v1794_v2 = vpop.f32.mrf.mxu0  ;;  %v2306_v3 = vpop.f32.mrf.mxu1 }
 0x167   : > { %v4729_v4 = vpack.c.bf16 %v2610_v44, %v2610_v44  ;;  %v2613_v6 = vmax.f32 %v1803_v62, 0.0  ;;  %v2741_v7 = vmax.f32 %v2315_v63, 0.0  ;;  %v1795_v8 = vadd.f32 %v6044_v59, %v1794_v2 }
 0x168   : > { %v4857_v5 = vpack.c.bf16 %v2738_v61, %v2738_v61  ;;  %3893 = vst.msk [vmem:[%s5723_s27 + $0x118] sm:$0xf] %vm3822_vm3, %v4731_v0  ;;  %4021 = vst.msk [vmem:[%s5723_s27 + $0x318] sm:$0xf] %vm3822_vm3, %v4859_v1  ;;  %v2307_v9 = vadd.f32 %v6044_v59, %v2306_v3  ;;  %v5125_v10 = vpop.f32.mrf.mxu0  ;;  %v5253_v11 = vpop.f32.mrf.mxu1 }
 0x169   : > { %3891 = vst.msk [vmem:[%s5723_s27 + $0x110] sm:$0xf] %vm3822_vm3, %v4729_v4  ;;  %v4732_v12 = vpack.c.bf16 %v2613_v6, %v2613_v6  ;;  %v4860_v13 = vpack.c.bf16 %v2741_v7, %v2741_v7  ;;  %v1816_v14 = vadd.f32 %v6044_v59, %v5125_v10  ;;  %v2328_v15 = vadd.f32 %v6044_v59, %v5253_v11 }
 0x16a   : > { %4019 = vst.msk [vmem:[%s5723_s27 + $0x310] sm:$0xf] %vm3822_vm3, %v4857_v5  ;;  %v2611_v16 = vmax.f32 %v1795_v8, 0.0  ;;  %v2739_v17 = vmax.f32 %v2307_v9, 0.0  ;;  %v1807_v18 = vpop.f32.mrf.mxu0  ;;  %v2319_v19 = vpop.f32.mrf.mxu1 }
 0x16b   : > { %3894 = vst.msk [vmem:[%s5723_s27 + $0x11c] sm:$0xf] %vm3822_vm3, %v4732_v12  ;;  %4022 = vst.msk [vmem:[%s5723_s27 + $0x31c] sm:$0xf] %vm3822_vm3, %v4860_v13  ;;  %v2616_v20 = vmax.f32 %v1816_v14, 0.0  ;;  %v2744_v21 = vmax.f32 %v2328_v15, 0.0  ;;  %v1808_v22 = vadd.f32 %v6044_v59, %v1807_v18  ;;  %v2320_v23 = vadd.f32 %v6044_v59, %v2319_v19 }
 0x16c   : > { %v4730_v24 = vpack.c.bf16 %v2611_v16, %v2611_v16  ;;  %v4858_v25 = vpack.c.bf16 %v2739_v17, %v2739_v17  ;;  %v5126_v26 = vpop.f32.mrf.mxu0  ;;  %v5254_v27 = vpop.f32.mrf.mxu1 }
 0x16d   : > { %v4735_v28 = vpack.c.bf16 %v2616_v20, %v2616_v20  ;;  %v4863_v29 = vpack.c.bf16 %v2744_v21, %v2744_v21  ;;  %v2614_v30 = vmax.f32 %v1808_v22, 0.0  ;;  %v2742_v31 = vmax.f32 %v2320_v23, 0.0 }
 0x16e   : > { %3892 = vst.msk [vmem:[%s5723_s27 + $0x114] sm:$0xf] %vm3822_vm3, %v4730_v24  ;;  %4020 = vst.msk [vmem:[%s5723_s27 + $0x314] sm:$0xf] %vm3822_vm3, %v4858_v25  ;;  %v1819_v32 = vadd.f32 %v6044_v59, %v5126_v26  ;;  %v2331_v33 = vadd.f32 %v6044_v59, %v5254_v27  ;;  %v1810_v34 = vpop.f32.mrf.mxu0  ;;  %v2322_v35 = vpop.f32.mrf.mxu1 }
 0x16f   : > { %3897 = vst.msk [vmem:[%s5723_s27 + $0x128] sm:$0xf] %vm3822_vm3, %v4735_v28  ;;  %4025 = vst.msk [vmem:[%s5723_s27 + $0x328] sm:$0xf] %vm3822_vm3, %v4863_v29  ;;  %v4733_v36 = vpack.c.bf16 %v2614_v30, %v2614_v30  ;;  %v4861_v37 = vpack.c.bf16 %v2742_v31, %v2742_v31  ;;  %v1811_v38 = vadd.f32 %v6044_v59, %v1810_v34 }
 0x170   : > { %v2323_v39 = vadd.f32 %v6044_v59, %v2322_v35  ;;  %v2617_v40 = vmax.f32 %v1819_v32, 0.0  ;;  %v2745_v41 = vmax.f32 %v2331_v33, 0.0  ;;  %v5129_v42 = vpop.f32.mrf.mxu0  ;;  %v5257_v43 = vpop.f32.mrf.mxu1 }
 0x171   : > { %3895 = vst.msk [vmem:[%s5723_s27 + $0x120] sm:$0xf] %vm3822_vm3, %v4733_v36  ;;  %4023 = vst.msk [vmem:[%s5723_s27 + $0x320] sm:$0xf] %vm3822_vm3, %v4861_v37  ;;  %v2615_v45 = vmax.f32 %v1811_v38, 0.0  ;;  %v1832_v47 = vadd.f32 %v6044_v59, %v5129_v42  ;;  %v2344_v48 = vadd.f32 %v6044_v59, %v5257_v43 }
 0x172   : > { %v2743_v46 = vmax.f32 %v2323_v39, 0.0  ;;  %v4736_v49 = vpack.c.bf16 %v2617_v40, %v2617_v40  ;;  %v4864_v50 = vpack.c.bf16 %v2745_v41, %v2745_v41  ;;  %v1823_v51 = vpop.f32.mrf.mxu0  ;;  %v2335_v52 = vpop.f32.mrf.mxu1 }
 0x173   : > { %v4734_v53 = vpack.c.bf16 %v2615_v45, %v2615_v45  ;;  %v2620_v55 = vmax.f32 %v1832_v47, 0.0  ;;  %v2748_v56 = vmax.f32 %v2344_v48, 0.0  ;;  %v1824_v57 = vadd.f32 %v6044_v59, %v1823_v51 }
 0x174   : > { %v4862_v54 = vpack.c.bf16 %v2743_v46, %v2743_v46  ;;  %3898 = vst.msk [vmem:[%s5723_s27 + $0x12c] sm:$0xf] %vm3822_vm3, %v4736_v49  ;;  %4026 = vst.msk [vmem:[%s5723_s27 + $0x32c] sm:$0xf] %vm3822_vm3, %v4864_v50  ;;  %v2336_v58 = vadd.f32 %v6044_v59, %v2335_v52  ;;  %v5130_v60 = vpop.f32.mrf.mxu0  ;;  %v5258_v44 = vpop.f32.mrf.mxu1 }
 0x175   : > { %3896 = vst.msk [vmem:[%s5723_s27 + $0x124] sm:$0xf] %vm3822_vm3, %v4734_v53  ;;  %v4739_v61 = vpack.c.bf16 %v2620_v55, %v2620_v55  ;;  %v4867_v62 = vpack.c.bf16 %v2748_v56, %v2748_v56  ;;  %v1835_v63 = vadd.f32 %v6044_v59, %v5130_v60  ;;  %v2347_v0 = vadd.f32 %v6044_v59, %v5258_v44 }
 0x176   : > { %4024 = vst.msk [vmem:[%s5723_s27 + $0x324] sm:$0xf] %vm3822_vm3, %v4862_v54  ;;  %v2618_v1 = vmax.f32 %v1824_v57, 0.0  ;;  %v2746_v2 = vmax.f32 %v2336_v58, 0.0  ;;  %v1826_v3 = vpop.f32.mrf.mxu0  ;;  %v2338_v4 = vpop.f32.mrf.mxu1 }
 0x177   : > { %3901 = vst.msk [vmem:[%s5723_s27 + $0x138] sm:$0xf] %vm3822_vm3, %v4739_v61  ;;  %4029 = vst.msk [vmem:[%s5723_s27 + $0x338] sm:$0xf] %vm3822_vm3, %v4867_v62  ;;  %v2621_v5 = vmax.f32 %v1835_v63, 0.0  ;;  %v2749_v6 = vmax.f32 %v2347_v0, 0.0  ;;  %v1827_v7 = vadd.f32 %v6044_v59, %v1826_v3  ;;  %v2339_v8 = vadd.f32 %v6044_v59, %v2338_v4 }
 0x178   : > { %v4737_v9 = vpack.c.bf16 %v2618_v1, %v2618_v1  ;;  %v4865_v10 = vpack.c.bf16 %v2746_v2, %v2746_v2  ;;  %v5133_v11 = vpop.f32.mrf.mxu0  ;;  %v5261_v12 = vpop.f32.mrf.mxu1 }
 0x179   : > { %v4740_v13 = vpack.c.bf16 %v2621_v5, %v2621_v5  ;;  %v4868_v14 = vpack.c.bf16 %v2749_v6, %v2749_v6  ;;  %v2619_v15 = vmax.f32 %v1827_v7, 0.0  ;;  %v2747_v16 = vmax.f32 %v2339_v8, 0.0 }
 0x17a   : > { %3899 = vst.msk [vmem:[%s5723_s27 + $0x130] sm:$0xf] %vm3822_vm3, %v4737_v9  ;;  %4027 = vst.msk [vmem:[%s5723_s27 + $0x330] sm:$0xf] %vm3822_vm3, %v4865_v10  ;;  %v1848_v17 = vadd.f32 %v6044_v59, %v5133_v11  ;;  %v2360_v18 = vadd.f32 %v6044_v59, %v5261_v12  ;;  %v1839_v19 = vpop.f32.mrf.mxu0  ;;  %v2351_v20 = vpop.f32.mrf.mxu1 }
 0x17b   : > { %3902 = vst.msk [vmem:[%s5723_s27 + $0x13c] sm:$0xf] %vm3822_vm3, %v4740_v13  ;;  %4030 = vst.msk [vmem:[%s5723_s27 + $0x33c] sm:$0xf] %vm3822_vm3, %v4868_v14  ;;  %v4738_v21 = vpack.c.bf16 %v2619_v15, %v2619_v15  ;;  %v4866_v22 = vpack.c.bf16 %v2747_v16, %v2747_v16  ;;  %v1840_v23 = vadd.f32 %v6044_v59, %v1839_v19 }
 0x17c   : > { %v2352_v24 = vadd.f32 %v6044_v59, %v2351_v20  ;;  %v2624_v25 = vmax.f32 %v1848_v17, 0.0  ;;  %v2752_v26 = vmax.f32 %v2360_v18, 0.0  ;;  %v5134_v27 = vpop.f32.mrf.mxu0  ;;  %v5262_v28 = vpop.f32.mrf.mxu1 }
 0x17d   : > { %3900 = vst.msk [vmem:[%s5723_s27 + $0x134] sm:$0xf] %vm3822_vm3, %v4738_v21  ;;  %4028 = vst.msk [vmem:[%s5723_s27 + $0x334] sm:$0xf] %vm3822_vm3, %v4866_v22  ;;  %v2622_v29 = vmax.f32 %v1840_v23, 0.0  ;;  %v1851_v31 = vadd.f32 %v6044_v59, %v5134_v27  ;;  %v2363_v32 = vadd.f32 %v6044_v59, %v5262_v28 }
 0x17e   : > { %v2750_v30 = vmax.f32 %v2352_v24, 0.0  ;;  %v4743_v33 = vpack.c.bf16 %v2624_v25, %v2624_v25  ;;  %v4871_v34 = vpack.c.bf16 %v2752_v26, %v2752_v26  ;;  %v1842_v35 = vpop.f32.mrf.mxu0  ;;  %v2354_v36 = vpop.f32.mrf.mxu1 }
 0x17f   : > { %v4741_v37 = vpack.c.bf16 %v2622_v29, %v2622_v29  ;;  %v2625_v39 = vmax.f32 %v1851_v31, 0.0  ;;  %v2753_v40 = vmax.f32 %v2363_v32, 0.0  ;;  %v1843_v41 = vadd.f32 %v6044_v59, %v1842_v35 }
 0x180   : > { %v4869_v38 = vpack.c.bf16 %v2750_v30, %v2750_v30  ;;  %3905 = vst.msk [vmem:[%s5723_s27 + $0x148] sm:$0xf] %vm3822_vm3, %v4743_v33  ;;  %4033 = vst.msk [vmem:[%s5723_s27 + $0x348] sm:$0xf] %vm3822_vm3, %v4871_v34  ;;  %v2355_v42 = vadd.f32 %v6044_v59, %v2354_v36  ;;  %v5137_v43 = vpop.f32.mrf.mxu0  ;;  %v5265_v45 = vpop.f32.mrf.mxu1 }
 0x181   : > { %3903 = vst.msk [vmem:[%s5723_s27 + $0x140] sm:$0xf] %vm3822_vm3, %v4741_v37  ;;  %v4744_v46 = vpack.c.bf16 %v2625_v39, %v2625_v39  ;;  %v4872_v47 = vpack.c.bf16 %v2753_v40, %v2753_v40  ;;  %v1864_v48 = vadd.f32 %v6044_v59, %v5137_v43  ;;  %v2376_v49 = vadd.f32 %v6044_v59, %v5265_v45 }
 0x182   : > { %4031 = vst.msk [vmem:[%s5723_s27 + $0x340] sm:$0xf] %vm3822_vm3, %v4869_v38  ;;  %v2623_v50 = vmax.f32 %v1843_v41, 0.0  ;;  %v2751_v51 = vmax.f32 %v2355_v42, 0.0  ;;  %v1855_v52 = vpop.f32.mrf.mxu0  ;;  %v2367_v53 = vpop.f32.mrf.mxu1 }
 0x183   : > { %3906 = vst.msk [vmem:[%s5723_s27 + $0x14c] sm:$0xf] %vm3822_vm3, %v4744_v46  ;;  %4034 = vst.msk [vmem:[%s5723_s27 + $0x34c] sm:$0xf] %vm3822_vm3, %v4872_v47  ;;  %v2628_v54 = vmax.f32 %v1864_v48, 0.0  ;;  %v2756_v55 = vmax.f32 %v2376_v49, 0.0  ;;  %v1856_v56 = vadd.f32 %v6044_v59, %v1855_v52  ;;  %v2368_v57 = vadd.f32 %v6044_v59, %v2367_v53 }
 0x184   : > { %v4742_v58 = vpack.c.bf16 %v2623_v50, %v2623_v50  ;;  %v4870_v60 = vpack.c.bf16 %v2751_v51, %v2751_v51  ;;  %v5138_v44 = vpop.f32.mrf.mxu0  ;;  %v5266_v61 = vpop.f32.mrf.mxu1 }
 0x185   : > { %v4747_v62 = vpack.c.bf16 %v2628_v54, %v2628_v54  ;;  %v4875_v63 = vpack.c.bf16 %v2756_v55, %v2756_v55  ;;  %v2626_v0 = vmax.f32 %v1856_v56, 0.0  ;;  %v2754_v1 = vmax.f32 %v2368_v57, 0.0 }
 0x186   : > { %3904 = vst.msk [vmem:[%s5723_s27 + $0x144] sm:$0xf] %vm3822_vm3, %v4742_v58  ;;  %4032 = vst.msk [vmem:[%s5723_s27 + $0x344] sm:$0xf] %vm3822_vm3, %v4870_v60  ;;  %v1867_v2 = vadd.f32 %v6044_v59, %v5138_v44  ;;  %v2379_v3 = vadd.f32 %v6044_v59, %v5266_v61  ;;  %v1858_v4 = vpop.f32.mrf.mxu0  ;;  %v2370_v5 = vpop.f32.mrf.mxu1 }
 0x187   : > { %3909 = vst.msk [vmem:[%s5723_s27 + $0x158] sm:$0xf] %vm3822_vm3, %v4747_v62  ;;  %4037 = vst.msk [vmem:[%s5723_s27 + $0x358] sm:$0xf] %vm3822_vm3, %v4875_v63  ;;  %v4745_v6 = vpack.c.bf16 %v2626_v0, %v2626_v0  ;;  %v4873_v7 = vpack.c.bf16 %v2754_v1, %v2754_v1  ;;  %v1859_v8 = vadd.f32 %v6044_v59, %v1858_v4 }
 0x188   : > { %v2371_v9 = vadd.f32 %v6044_v59, %v2370_v5  ;;  %v2629_v10 = vmax.f32 %v1867_v2, 0.0  ;;  %v2757_v11 = vmax.f32 %v2379_v3, 0.0  ;;  %v5141_v12 = vpop.f32.mrf.mxu0  ;;  %v5269_v13 = vpop.f32.mrf.mxu1 }
 0x189   : > { %3907 = vst.msk [vmem:[%s5723_s27 + $0x150] sm:$0xf] %vm3822_vm3, %v4745_v6  ;;  %4035 = vst.msk [vmem:[%s5723_s27 + $0x350] sm:$0xf] %vm3822_vm3, %v4873_v7  ;;  %v2627_v14 = vmax.f32 %v1859_v8, 0.0  ;;  %v1880_v16 = vadd.f32 %v6044_v59, %v5141_v12  ;;  %v2392_v17 = vadd.f32 %v6044_v59, %v5269_v13 }
 0x18a   : > { %v2755_v15 = vmax.f32 %v2371_v9, 0.0  ;;  %v4748_v18 = vpack.c.bf16 %v2629_v10, %v2629_v10  ;;  %v4876_v19 = vpack.c.bf16 %v2757_v11, %v2757_v11  ;;  %v1871_v20 = vpop.f32.mrf.mxu0  ;;  %v2383_v21 = vpop.f32.mrf.mxu1 }
 0x18b   : > { %v4746_v22 = vpack.c.bf16 %v2627_v14, %v2627_v14  ;;  %v2632_v24 = vmax.f32 %v1880_v16, 0.0  ;;  %v2760_v25 = vmax.f32 %v2392_v17, 0.0  ;;  %v1872_v26 = vadd.f32 %v6044_v59, %v1871_v20 }
 0x18c   : > { %v4874_v23 = vpack.c.bf16 %v2755_v15, %v2755_v15  ;;  %3910 = vst.msk [vmem:[%s5723_s27 + $0x15c] sm:$0xf] %vm3822_vm3, %v4748_v18  ;;  %4038 = vst.msk [vmem:[%s5723_s27 + $0x35c] sm:$0xf] %vm3822_vm3, %v4876_v19  ;;  %v2384_v27 = vadd.f32 %v6044_v59, %v2383_v21  ;;  %v5142_v28 = vpop.f32.mrf.mxu0  ;;  %v5270_v29 = vpop.f32.mrf.mxu1 }
 0x18d   : > { %3908 = vst.msk [vmem:[%s5723_s27 + $0x154] sm:$0xf] %vm3822_vm3, %v4746_v22  ;;  %v4751_v30 = vpack.c.bf16 %v2632_v24, %v2632_v24  ;;  %v4879_v31 = vpack.c.bf16 %v2760_v25, %v2760_v25  ;;  %v1883_v32 = vadd.f32 %v6044_v59, %v5142_v28  ;;  %v2395_v33 = vadd.f32 %v6044_v59, %v5270_v29 }
 0x18e   : > { %4036 = vst.msk [vmem:[%s5723_s27 + $0x354] sm:$0xf] %vm3822_vm3, %v4874_v23  ;;  %v2630_v34 = vmax.f32 %v1872_v26, 0.0  ;;  %v2758_v35 = vmax.f32 %v2384_v27, 0.0  ;;  %v1874_v36 = vpop.f32.mrf.mxu0  ;;  %v2386_v37 = vpop.f32.mrf.mxu1 }
 0x18f   : > { %3913 = vst.msk [vmem:[%s5723_s27 + $0x168] sm:$0xf] %vm3822_vm3, %v4751_v30  ;;  %4041 = vst.msk [vmem:[%s5723_s27 + $0x368] sm:$0xf] %vm3822_vm3, %v4879_v31  ;;  %v2633_v38 = vmax.f32 %v1883_v32, 0.0  ;;  %v2761_v39 = vmax.f32 %v2395_v33, 0.0  ;;  %v1875_v40 = vadd.f32 %v6044_v59, %v1874_v36  ;;  %v2387_v41 = vadd.f32 %v6044_v59, %v2386_v37 }
 0x190   : > { %v4749_v42 = vpack.c.bf16 %v2630_v34, %v2630_v34  ;;  %v4877_v43 = vpack.c.bf16 %v2758_v35, %v2758_v35  ;;  %v5145_v45 = vpop.f32.mrf.mxu0  ;;  %v5273_v46 = vpop.f32.mrf.mxu1  ;;  %v6361_v35 = vld [vmem:[%s6556_s2] ss:$0 sm:$0xff] }
 0x191   : > { %v4752_v47 = vpack.c.bf16 %v2633_v38, %v2633_v38  ;;  %v4880_v48 = vpack.c.bf16 %v2761_v39, %v2761_v39  ;;  %v2631_v49 = vmax.f32 %v1875_v40, 0.0  ;;  %v2759_v50 = vmax.f32 %v2387_v41, 0.0 }
 0x192   : > { %3911 = vst.msk [vmem:[%s5723_s27 + $0x160] sm:$0xf] %vm3822_vm3, %v4749_v42  ;;  %4039 = vst.msk [vmem:[%s5723_s27 + $0x360] sm:$0xf] %vm3822_vm3, %v4877_v43  ;;  %v1896_v51 = vadd.f32 %v6044_v59, %v5145_v45  ;;  %v2408_v52 = vadd.f32 %v6044_v59, %v5273_v46  ;;  %v1887_v53 = vpop.f32.mrf.mxu0  ;;  %v2399_v54 = vpop.f32.mrf.mxu1 }
 0x193   : > { %3914 = vst.msk [vmem:[%s5723_s27 + $0x16c] sm:$0xf] %vm3822_vm3, %v4752_v47  ;;  %4042 = vst.msk [vmem:[%s5723_s27 + $0x36c] sm:$0xf] %vm3822_vm3, %v4880_v48  ;;  %v4750_v55 = vpack.c.bf16 %v2631_v49, %v2631_v49  ;;  %v4878_v56 = vpack.c.bf16 %v2759_v50, %v2759_v50  ;;  %v1888_v57 = vadd.f32 %v6044_v59, %v1887_v53 }
 0x194   : > { %v2400_v58 = vadd.f32 %v6044_v59, %v2399_v54  ;;  %v2636_v60 = vmax.f32 %v1896_v51, 0.0  ;;  %v2764_v44 = vmax.f32 %v2408_v52, 0.0  ;;  %v5146_v61 = vpop.f32.mrf.mxu0  ;;  %v5274_v62 = vpop.f32.mrf.mxu1 }
 0x195   : > { %3912 = vst.msk [vmem:[%s5723_s27 + $0x164] sm:$0xf] %vm3822_vm3, %v4750_v55  ;;  %4040 = vst.msk [vmem:[%s5723_s27 + $0x364] sm:$0xf] %vm3822_vm3, %v4878_v56  ;;  %v2634_v63 = vmax.f32 %v1888_v57, 0.0  ;;  %v1899_v1 = vadd.f32 %v6044_v59, %v5146_v61  ;;  %v2411_v2 = vadd.f32 %v6044_v59, %v5274_v62 }
 0x196   : > { %v2762_v0 = vmax.f32 %v2400_v58, 0.0  ;;  %v4755_v3 = vpack.c.bf16 %v2636_v60, %v2636_v60  ;;  %v4883_v4 = vpack.c.bf16 %v2764_v44, %v2764_v44  ;;  %v1890_v5 = vpop.f32.mrf.mxu0  ;;  %v2402_v6 = vpop.f32.mrf.mxu1 }
 0x197   : > { %v4753_v7 = vpack.c.bf16 %v2634_v63, %v2634_v63  ;;  %v2637_v9 = vmax.f32 %v1899_v1, 0.0  ;;  %v2765_v10 = vmax.f32 %v2411_v2, 0.0  ;;  %v1891_v11 = vadd.f32 %v6044_v59, %v1890_v5 }
 0x198   : > { %v4881_v8 = vpack.c.bf16 %v2762_v0, %v2762_v0  ;;  %3917 = vst.msk [vmem:[%s5723_s27 + $0x178] sm:$0xf] %vm3822_vm3, %v4755_v3  ;;  %4045 = vst.msk [vmem:[%s5723_s27 + $0x378] sm:$0xf] %vm3822_vm3, %v4883_v4  ;;  %v2403_v12 = vadd.f32 %v6044_v59, %v2402_v6  ;;  %v5149_v13 = vpop.f32.mrf.mxu0  ;;  %v5277_v14 = vpop.f32.mrf.mxu1 }
 0x199   : > { %3915 = vst.msk [vmem:[%s5723_s27 + $0x170] sm:$0xf] %vm3822_vm3, %v4753_v7  ;;  %v4756_v15 = vpack.c.bf16 %v2637_v9, %v2637_v9  ;;  %v4884_v16 = vpack.c.bf16 %v2765_v10, %v2765_v10  ;;  %v1912_v17 = vadd.f32 %v6044_v59, %v5149_v13  ;;  %v2424_v18 = vadd.f32 %v6044_v59, %v5277_v14 }
 0x19a   : > { %4043 = vst.msk [vmem:[%s5723_s27 + $0x370] sm:$0xf] %vm3822_vm3, %v4881_v8  ;;  %v2635_v19 = vmax.f32 %v1891_v11, 0.0  ;;  %v2763_v20 = vmax.f32 %v2403_v12, 0.0  ;;  %v1903_v21 = vpop.f32.mrf.mxu0  ;;  %v2415_v22 = vpop.f32.mrf.mxu1 }
 0x19b   : > { %3918 = vst.msk [vmem:[%s5723_s27 + $0x17c] sm:$0xf] %vm3822_vm3, %v4756_v15  ;;  %4046 = vst.msk [vmem:[%s5723_s27 + $0x37c] sm:$0xf] %vm3822_vm3, %v4884_v16  ;;  %v2640_v23 = vmax.f32 %v1912_v17, 0.0  ;;  %v2768_v24 = vmax.f32 %v2424_v18, 0.0  ;;  %v1904_v25 = vadd.f32 %v6044_v59, %v1903_v21  ;;  %v2416_v26 = vadd.f32 %v6044_v59, %v2415_v22 }
 0x19c   : > { %v4754_v27 = vpack.c.bf16 %v2635_v19, %v2635_v19  ;;  %v4882_v28 = vpack.c.bf16 %v2763_v20, %v2763_v20  ;;  %v5150_v29 = vpop.f32.mrf.mxu0  ;;  %v5278_v30 = vpop.f32.mrf.mxu1 }
 0x19d   : > { %v4759_v31 = vpack.c.bf16 %v2640_v23, %v2640_v23  ;;  %v4887_v32 = vpack.c.bf16 %v2768_v24, %v2768_v24  ;;  %v2638_v33 = vmax.f32 %v1904_v25, 0.0  ;;  %v2766_v34 = vmax.f32 %v2416_v26, 0.0 }
 0x19e   : > { %3916 = vst.msk [vmem:[%s5723_s27 + $0x174] sm:$0xf] %vm3822_vm3, %v4754_v27  ;;  %4044 = vst.msk [vmem:[%s5723_s27 + $0x374] sm:$0xf] %vm3822_vm3, %v4882_v28  ;;  %v1915_v59 = vadd.f32 %v6361_v35, %v5150_v29  ;;  %v2427_v36 = vadd.f32 %v6361_v35, %v5278_v30  ;;  %v1906_v37 = vpop.f32.mrf.mxu0  ;;  %v2418_v38 = vpop.f32.mrf.mxu1 }
 0x19f   : > { %3921 = vst.msk [vmem:[%s5723_s27 + $0x188] sm:$0xf] %vm3822_vm3, %v4759_v31  ;;  %4049 = vst.msk [vmem:[%s5723_s27 + $0x388] sm:$0xf] %vm3822_vm3, %v4887_v32  ;;  %v4757_v39 = vpack.c.bf16 %v2638_v33, %v2638_v33  ;;  %v4885_v40 = vpack.c.bf16 %v2766_v34, %v2766_v34  ;;  %v1907_v41 = vadd.f32 %v6361_v35, %v1906_v37 }
 0x1a0   : > { %v2419_v42 = vadd.f32 %v6361_v35, %v2418_v38  ;;  %v2641_v43 = vmax.f32 %v1915_v59, 0.0  ;;  %v2769_v45 = vmax.f32 %v2427_v36, 0.0  ;;  %v5153_v46 = vpop.f32.mrf.mxu0  ;;  %v5281_v47 = vpop.f32.mrf.mxu1 }
 0x1a1   : > { %3919 = vst.msk [vmem:[%s5723_s27 + $0x180] sm:$0xf] %vm3822_vm3, %v4757_v39  ;;  %4047 = vst.msk [vmem:[%s5723_s27 + $0x380] sm:$0xf] %vm3822_vm3, %v4885_v40  ;;  %v2639_v48 = vmax.f32 %v1907_v41, 0.0  ;;  %v1928_v50 = vadd.f32 %v6361_v35, %v5153_v46  ;;  %v2440_v51 = vadd.f32 %v6361_v35, %v5281_v47 }
 0x1a2   : > { %v2767_v49 = vmax.f32 %v2419_v42, 0.0  ;;  %v4760_v52 = vpack.c.bf16 %v2641_v43, %v2641_v43  ;;  %v4888_v53 = vpack.c.bf16 %v2769_v45, %v2769_v45  ;;  %v1919_v54 = vpop.f32.mrf.mxu0  ;;  %v2431_v55 = vpop.f32.mrf.mxu1 }
 0x1a3   : > { %v4758_v56 = vpack.c.bf16 %v2639_v48, %v2639_v48  ;;  %v2644_v58 = vmax.f32 %v1928_v50, 0.0  ;;  %v2772_v60 = vmax.f32 %v2440_v51, 0.0  ;;  %v1920_v44 = vadd.f32 %v6361_v35, %v1919_v54 }
 0x1a4   : > { %v4886_v57 = vpack.c.bf16 %v2767_v49, %v2767_v49  ;;  %3922 = vst.msk [vmem:[%s5723_s27 + $0x18c] sm:$0xf] %vm3822_vm3, %v4760_v52  ;;  %4050 = vst.msk [vmem:[%s5723_s27 + $0x38c] sm:$0xf] %vm3822_vm3, %v4888_v53  ;;  %v2432_v61 = vadd.f32 %v6361_v35, %v2431_v55  ;;  %v5154_v62 = vpop.f32.mrf.mxu0  ;;  %v5282_v63 = vpop.f32.mrf.mxu1 }
 0x1a5   : > { %3920 = vst.msk [vmem:[%s5723_s27 + $0x184] sm:$0xf] %vm3822_vm3, %v4758_v56  ;;  %v4763_v0 = vpack.c.bf16 %v2644_v58, %v2644_v58  ;;  %v4891_v1 = vpack.c.bf16 %v2772_v60, %v2772_v60  ;;  %v1931_v2 = vadd.f32 %v6361_v35, %v5154_v62  ;;  %v2443_v3 = vadd.f32 %v6361_v35, %v5282_v63 }
 0x1a6   : > { %4048 = vst.msk [vmem:[%s5723_s27 + $0x384] sm:$0xf] %vm3822_vm3, %v4886_v57  ;;  %v2642_v4 = vmax.f32 %v1920_v44, 0.0  ;;  %v2770_v5 = vmax.f32 %v2432_v61, 0.0  ;;  %v1922_v6 = vpop.f32.mrf.mxu0  ;;  %v2434_v7 = vpop.f32.mrf.mxu1 }
 0x1a7   : > { %3925 = vst.msk [vmem:[%s5723_s27 + $0x198] sm:$0xf] %vm3822_vm3, %v4763_v0  ;;  %4053 = vst.msk [vmem:[%s5723_s27 + $0x398] sm:$0xf] %vm3822_vm3, %v4891_v1  ;;  %v2645_v8 = vmax.f32 %v1931_v2, 0.0  ;;  %v2773_v9 = vmax.f32 %v2443_v3, 0.0  ;;  %v1923_v10 = vadd.f32 %v6361_v35, %v1922_v6  ;;  %v2435_v11 = vadd.f32 %v6361_v35, %v2434_v7 }
 0x1a8   : > { %v4761_v12 = vpack.c.bf16 %v2642_v4, %v2642_v4  ;;  %v4889_v13 = vpack.c.bf16 %v2770_v5, %v2770_v5  ;;  %v5157_v14 = vpop.f32.mrf.mxu0  ;;  %v5285_v15 = vpop.f32.mrf.mxu1 }
 0x1a9   : > { %v4764_v16 = vpack.c.bf16 %v2645_v8, %v2645_v8  ;;  %v4892_v17 = vpack.c.bf16 %v2773_v9, %v2773_v9  ;;  %v2643_v18 = vmax.f32 %v1923_v10, 0.0  ;;  %v2771_v19 = vmax.f32 %v2435_v11, 0.0 }
 0x1aa   : > { %3923 = vst.msk [vmem:[%s5723_s27 + $0x190] sm:$0xf] %vm3822_vm3, %v4761_v12  ;;  %4051 = vst.msk [vmem:[%s5723_s27 + $0x390] sm:$0xf] %vm3822_vm3, %v4889_v13  ;;  %v1944_v20 = vadd.f32 %v6361_v35, %v5157_v14  ;;  %v2456_v21 = vadd.f32 %v6361_v35, %v5285_v15  ;;  %v1935_v22 = vpop.f32.mrf.mxu0  ;;  %v2447_v23 = vpop.f32.mrf.mxu1 }
 0x1ab   : > { %3926 = vst.msk [vmem:[%s5723_s27 + $0x19c] sm:$0xf] %vm3822_vm3, %v4764_v16  ;;  %4054 = vst.msk [vmem:[%s5723_s27 + $0x39c] sm:$0xf] %vm3822_vm3, %v4892_v17  ;;  %v4762_v24 = vpack.c.bf16 %v2643_v18, %v2643_v18  ;;  %v4890_v25 = vpack.c.bf16 %v2771_v19, %v2771_v19  ;;  %v1936_v26 = vadd.f32 %v6361_v35, %v1935_v22 }
 0x1ac   : > { %v2448_v27 = vadd.f32 %v6361_v35, %v2447_v23  ;;  %v2648_v28 = vmax.f32 %v1944_v20, 0.0  ;;  %v2776_v29 = vmax.f32 %v2456_v21, 0.0  ;;  %v5158_v30 = vpop.f32.mrf.mxu0  ;;  %v5286_v31 = vpop.f32.mrf.mxu1 }
 0x1ad   : > { %3924 = vst.msk [vmem:[%s5723_s27 + $0x194] sm:$0xf] %vm3822_vm3, %v4762_v24  ;;  %4052 = vst.msk [vmem:[%s5723_s27 + $0x394] sm:$0xf] %vm3822_vm3, %v4890_v25  ;;  %v2646_v32 = vmax.f32 %v1936_v26, 0.0  ;;  %v1947_v34 = vadd.f32 %v6361_v35, %v5158_v30  ;;  %v2459_v59 = vadd.f32 %v6361_v35, %v5286_v31 }
 0x1ae   : > { %v2774_v33 = vmax.f32 %v2448_v27, 0.0  ;;  %v4767_v36 = vpack.c.bf16 %v2648_v28, %v2648_v28  ;;  %v4895_v37 = vpack.c.bf16 %v2776_v29, %v2776_v29  ;;  %v1938_v38 = vpop.f32.mrf.mxu0  ;;  %v2450_v39 = vpop.f32.mrf.mxu1 }
 0x1af   : > { %v4765_v40 = vpack.c.bf16 %v2646_v32, %v2646_v32  ;;  %v2649_v42 = vmax.f32 %v1947_v34, 0.0  ;;  %v2777_v43 = vmax.f32 %v2459_v59, 0.0  ;;  %v1939_v45 = vadd.f32 %v6361_v35, %v1938_v38 }
 0x1b0   : > { %v4893_v41 = vpack.c.bf16 %v2774_v33, %v2774_v33  ;;  %3929 = vst.msk [vmem:[%s5723_s27 + $0x1a8] sm:$0xf] %vm3822_vm3, %v4767_v36  ;;  %4057 = vst.msk [vmem:[%s5723_s27 + $0x3a8] sm:$0xf] %vm3822_vm3, %v4895_v37  ;;  %v2451_v46 = vadd.f32 %v6361_v35, %v2450_v39  ;;  %v5161_v47 = vpop.f32.mrf.mxu0  ;;  %v5289_v48 = vpop.f32.mrf.mxu1 }
 0x1b1   : > { %3927 = vst.msk [vmem:[%s5723_s27 + $0x1a0] sm:$0xf] %vm3822_vm3, %v4765_v40  ;;  %v4768_v49 = vpack.c.bf16 %v2649_v42, %v2649_v42  ;;  %v4896_v50 = vpack.c.bf16 %v2777_v43, %v2777_v43  ;;  %v1960_v51 = vadd.f32 %v6361_v35, %v5161_v47  ;;  %v2472_v52 = vadd.f32 %v6361_v35, %v5289_v48 }
 0x1b2   : > { %4055 = vst.msk [vmem:[%s5723_s27 + $0x3a0] sm:$0xf] %vm3822_vm3, %v4893_v41  ;;  %v2647_v53 = vmax.f32 %v1939_v45, 0.0  ;;  %v2775_v54 = vmax.f32 %v2451_v46, 0.0  ;;  %v1951_v55 = vpop.f32.mrf.mxu0  ;;  %v2463_v56 = vpop.f32.mrf.mxu1 }
 0x1b3   : > { %3930 = vst.msk [vmem:[%s5723_s27 + $0x1ac] sm:$0xf] %vm3822_vm3, %v4768_v49  ;;  %4058 = vst.msk [vmem:[%s5723_s27 + $0x3ac] sm:$0xf] %vm3822_vm3, %v4896_v50  ;;  %v2652_v57 = vmax.f32 %v1960_v51, 0.0  ;;  %v2780_v58 = vmax.f32 %v2472_v52, 0.0  ;;  %v1952_v60 = vadd.f32 %v6361_v35, %v1951_v55  ;;  %v2464_v44 = vadd.f32 %v6361_v35, %v2463_v56 }
 0x1b4   : > { %v4766_v61 = vpack.c.bf16 %v2647_v53, %v2647_v53  ;;  %v4894_v62 = vpack.c.bf16 %v2775_v54, %v2775_v54  ;;  %v5162_v63 = vpop.f32.mrf.mxu0  ;;  %v5290_v0 = vpop.f32.mrf.mxu1 }
 0x1b5   : > { %v4771_v1 = vpack.c.bf16 %v2652_v57, %v2652_v57  ;;  %v4899_v2 = vpack.c.bf16 %v2780_v58, %v2780_v58  ;;  %v2650_v3 = vmax.f32 %v1952_v60, 0.0  ;;  %v2778_v4 = vmax.f32 %v2464_v44, 0.0 }
 0x1b6   : > { %3928 = vst.msk [vmem:[%s5723_s27 + $0x1a4] sm:$0xf] %vm3822_vm3, %v4766_v61  ;;  %4056 = vst.msk [vmem:[%s5723_s27 + $0x3a4] sm:$0xf] %vm3822_vm3, %v4894_v62  ;;  %v1963_v5 = vadd.f32 %v6361_v35, %v5162_v63  ;;  %v2475_v6 = vadd.f32 %v6361_v35, %v5290_v0  ;;  %v1954_v7 = vpop.f32.mrf.mxu0  ;;  %v2466_v8 = vpop.f32.mrf.mxu1 }
 0x1b7   : > { %3933 = vst.msk [vmem:[%s5723_s27 + $0x1b8] sm:$0xf] %vm3822_vm3, %v4771_v1  ;;  %4061 = vst.msk [vmem:[%s5723_s27 + $0x3b8] sm:$0xf] %vm3822_vm3, %v4899_v2  ;;  %v4769_v9 = vpack.c.bf16 %v2650_v3, %v2650_v3  ;;  %v4897_v10 = vpack.c.bf16 %v2778_v4, %v2778_v4  ;;  %v1955_v11 = vadd.f32 %v6361_v35, %v1954_v7 }
 0x1b8   : > { %v2467_v12 = vadd.f32 %v6361_v35, %v2466_v8  ;;  %v2653_v13 = vmax.f32 %v1963_v5, 0.0  ;;  %v2781_v14 = vmax.f32 %v2475_v6, 0.0  ;;  %v5165_v15 = vpop.f32.mrf.mxu0  ;;  %v5293_v16 = vpop.f32.mrf.mxu1 }
 0x1b9   : > { %3931 = vst.msk [vmem:[%s5723_s27 + $0x1b0] sm:$0xf] %vm3822_vm3, %v4769_v9  ;;  %4059 = vst.msk [vmem:[%s5723_s27 + $0x3b0] sm:$0xf] %vm3822_vm3, %v4897_v10  ;;  %v2651_v17 = vmax.f32 %v1955_v11, 0.0  ;;  %v1976_v19 = vadd.f32 %v6361_v35, %v5165_v15  ;;  %v2488_v20 = vadd.f32 %v6361_v35, %v5293_v16 }
 0x1ba   : > { %v2779_v18 = vmax.f32 %v2467_v12, 0.0  ;;  %v4772_v21 = vpack.c.bf16 %v2653_v13, %v2653_v13  ;;  %v4900_v22 = vpack.c.bf16 %v2781_v14, %v2781_v14  ;;  %v1967_v23 = vpop.f32.mrf.mxu0  ;;  %v2479_v24 = vpop.f32.mrf.mxu1 }
 0x1bb   : > { %v4770_v25 = vpack.c.bf16 %v2651_v17, %v2651_v17  ;;  %v2656_v27 = vmax.f32 %v1976_v19, 0.0  ;;  %v2784_v28 = vmax.f32 %v2488_v20, 0.0  ;;  %v1968_v29 = vadd.f32 %v6361_v35, %v1967_v23 }
 0x1bc   : > { %v4898_v26 = vpack.c.bf16 %v2779_v18, %v2779_v18  ;;  %3934 = vst.msk [vmem:[%s5723_s27 + $0x1bc] sm:$0xf] %vm3822_vm3, %v4772_v21  ;;  %4062 = vst.msk [vmem:[%s5723_s27 + $0x3bc] sm:$0xf] %vm3822_vm3, %v4900_v22  ;;  %v2480_v30 = vadd.f32 %v6361_v35, %v2479_v24  ;;  %v5166_v31 = vpop.f32.mrf.mxu0  ;;  %v5294_v32 = vpop.f32.mrf.mxu1 }
 0x1bd   : > { %3932 = vst.msk [vmem:[%s5723_s27 + $0x1b4] sm:$0xf] %vm3822_vm3, %v4770_v25  ;;  %v4775_v33 = vpack.c.bf16 %v2656_v27, %v2656_v27  ;;  %v4903_v34 = vpack.c.bf16 %v2784_v28, %v2784_v28  ;;  %v1979_v59 = vadd.f32 %v6361_v35, %v5166_v31  ;;  %v2491_v36 = vadd.f32 %v6361_v35, %v5294_v32 }
 0x1be   : > { %4060 = vst.msk [vmem:[%s5723_s27 + $0x3b4] sm:$0xf] %vm3822_vm3, %v4898_v26  ;;  %v2654_v37 = vmax.f32 %v1968_v29, 0.0  ;;  %v2782_v38 = vmax.f32 %v2480_v30, 0.0  ;;  %v1970_v39 = vpop.f32.mrf.mxu0  ;;  %v2482_v40 = vpop.f32.mrf.mxu1 }
 0x1bf   : > { %3937 = vst.msk [vmem:[%s5723_s27 + $0x1c8] sm:$0xf] %vm3822_vm3, %v4775_v33  ;;  %4065 = vst.msk [vmem:[%s5723_s27 + $0x3c8] sm:$0xf] %vm3822_vm3, %v4903_v34  ;;  %v2657_v41 = vmax.f32 %v1979_v59, 0.0  ;;  %v2785_v42 = vmax.f32 %v2491_v36, 0.0  ;;  %v1971_v43 = vadd.f32 %v6361_v35, %v1970_v39  ;;  %v2483_v45 = vadd.f32 %v6361_v35, %v2482_v40 }
 0x1c0   : > { %v4773_v46 = vpack.c.bf16 %v2654_v37, %v2654_v37  ;;  %v4901_v47 = vpack.c.bf16 %v2782_v38, %v2782_v38  ;;  %v5169_v48 = vpop.f32.mrf.mxu0  ;;  %v5297_v49 = vpop.f32.mrf.mxu1 }
 0x1c1   : > { %v4776_v50 = vpack.c.bf16 %v2657_v41, %v2657_v41  ;;  %v4904_v51 = vpack.c.bf16 %v2785_v42, %v2785_v42  ;;  %v2655_v52 = vmax.f32 %v1971_v43, 0.0  ;;  %v2783_v53 = vmax.f32 %v2483_v45, 0.0 }
 0x1c2   : > { %3935 = vst.msk [vmem:[%s5723_s27 + $0x1c0] sm:$0xf] %vm3822_vm3, %v4773_v46  ;;  %4063 = vst.msk [vmem:[%s5723_s27 + $0x3c0] sm:$0xf] %vm3822_vm3, %v4901_v47  ;;  %v1992_v54 = vadd.f32 %v6361_v35, %v5169_v48  ;;  %v2504_v55 = vadd.f32 %v6361_v35, %v5297_v49  ;;  %v1983_v56 = vpop.f32.mrf.mxu0  ;;  %v2495_v57 = vpop.f32.mrf.mxu1 }
 0x1c3   : > { %3938 = vst.msk [vmem:[%s5723_s27 + $0x1cc] sm:$0xf] %vm3822_vm3, %v4776_v50  ;;  %4066 = vst.msk [vmem:[%s5723_s27 + $0x3cc] sm:$0xf] %vm3822_vm3, %v4904_v51  ;;  %v4774_v58 = vpack.c.bf16 %v2655_v52, %v2655_v52  ;;  %v4902_v60 = vpack.c.bf16 %v2783_v53, %v2783_v53  ;;  %v1984_v44 = vadd.f32 %v6361_v35, %v1983_v56 }
 0x1c4   : > { %v2496_v61 = vadd.f32 %v6361_v35, %v2495_v57  ;;  %v2660_v62 = vmax.f32 %v1992_v54, 0.0  ;;  %v2788_v63 = vmax.f32 %v2504_v55, 0.0  ;;  %v5170_v0 = vpop.f32.mrf.mxu0  ;;  %v5298_v1 = vpop.f32.mrf.mxu1 }
 0x1c5   : > { %3936 = vst.msk [vmem:[%s5723_s27 + $0x1c4] sm:$0xf] %vm3822_vm3, %v4774_v58  ;;  %4064 = vst.msk [vmem:[%s5723_s27 + $0x3c4] sm:$0xf] %vm3822_vm3, %v4902_v60  ;;  %v2658_v2 = vmax.f32 %v1984_v44, 0.0  ;;  %v1995_v4 = vadd.f32 %v6361_v35, %v5170_v0  ;;  %v2507_v5 = vadd.f32 %v6361_v35, %v5298_v1 }
 0x1c6   : > { %v2786_v3 = vmax.f32 %v2496_v61, 0.0  ;;  %v4779_v6 = vpack.c.bf16 %v2660_v62, %v2660_v62  ;;  %v4907_v7 = vpack.c.bf16 %v2788_v63, %v2788_v63  ;;  %v1986_v8 = vpop.f32.mrf.mxu0  ;;  %v2498_v9 = vpop.f32.mrf.mxu1 }
 0x1c7   : > { %v4777_v10 = vpack.c.bf16 %v2658_v2, %v2658_v2  ;;  %v2661_v12 = vmax.f32 %v1995_v4, 0.0  ;;  %v2789_v13 = vmax.f32 %v2507_v5, 0.0  ;;  %v1987_v14 = vadd.f32 %v6361_v35, %v1986_v8 }
 0x1c8   : > { %v4905_v11 = vpack.c.bf16 %v2786_v3, %v2786_v3  ;;  %3941 = vst.msk [vmem:[%s5723_s27 + $0x1d8] sm:$0xf] %vm3822_vm3, %v4779_v6  ;;  %4069 = vst.msk [vmem:[%s5723_s27 + $0x3d8] sm:$0xf] %vm3822_vm3, %v4907_v7  ;;  %v2499_v15 = vadd.f32 %v6361_v35, %v2498_v9  ;;  %v5173_v16 = vpop.f32.mrf.mxu0  ;;  %v5301_v17 = vpop.f32.mrf.mxu1 }
 0x1c9   : > { %3939 = vst.msk [vmem:[%s5723_s27 + $0x1d0] sm:$0xf] %vm3822_vm3, %v4777_v10  ;;  %v4780_v18 = vpack.c.bf16 %v2661_v12, %v2661_v12  ;;  %v4908_v19 = vpack.c.bf16 %v2789_v13, %v2789_v13  ;;  %v2008_v20 = vadd.f32 %v6361_v35, %v5173_v16  ;;  %v2520_v21 = vadd.f32 %v6361_v35, %v5301_v17 }
 0x1ca   : > { %4067 = vst.msk [vmem:[%s5723_s27 + $0x3d0] sm:$0xf] %vm3822_vm3, %v4905_v11  ;;  %v2659_v22 = vmax.f32 %v1987_v14, 0.0  ;;  %v2787_v23 = vmax.f32 %v2499_v15, 0.0  ;;  %v1999_v24 = vpop.f32.mrf.mxu0  ;;  %v2511_v25 = vpop.f32.mrf.mxu1 }
 0x1cb   : > { %3942 = vst.msk [vmem:[%s5723_s27 + $0x1dc] sm:$0xf] %vm3822_vm3, %v4780_v18  ;;  %4070 = vst.msk [vmem:[%s5723_s27 + $0x3dc] sm:$0xf] %vm3822_vm3, %v4908_v19  ;;  %v2664_v26 = vmax.f32 %v2008_v20, 0.0  ;;  %v2792_v27 = vmax.f32 %v2520_v21, 0.0  ;;  %v2000_v28 = vadd.f32 %v6361_v35, %v1999_v24  ;;  %v2512_v29 = vadd.f32 %v6361_v35, %v2511_v25 }
 0x1cc   : > { %v4778_v30 = vpack.c.bf16 %v2659_v22, %v2659_v22  ;;  %v4906_v31 = vpack.c.bf16 %v2787_v23, %v2787_v23  ;;  %v5174_v32 = vpop.f32.mrf.mxu0  ;;  %v5302_v33 = vpop.f32.mrf.mxu1 }
 0x1cd   : > { %v4783_v34 = vpack.c.bf16 %v2664_v26, %v2664_v26  ;;  %v4911_v59 = vpack.c.bf16 %v2792_v27, %v2792_v27  ;;  %v2662_v36 = vmax.f32 %v2000_v28, 0.0  ;;  %v2790_v37 = vmax.f32 %v2512_v29, 0.0 }
 0x1ce   : > { %3940 = vst.msk [vmem:[%s5723_s27 + $0x1d4] sm:$0xf] %vm3822_vm3, %v4778_v30  ;;  %4068 = vst.msk [vmem:[%s5723_s27 + $0x3d4] sm:$0xf] %vm3822_vm3, %v4906_v31  ;;  %v2011_v38 = vadd.f32 %v6361_v35, %v5174_v32  ;;  %v2523_v39 = vadd.f32 %v6361_v35, %v5302_v33  ;;  %v2002_v40 = vpop.f32.mrf.mxu0  ;;  %v2514_v41 = vpop.f32.mrf.mxu1 }
 0x1cf   : > { %3945 = vst.msk [vmem:[%s5723_s27 + $0x1e8] sm:$0xf] %vm3822_vm3, %v4783_v34  ;;  %4073 = vst.msk [vmem:[%s5723_s27 + $0x3e8] sm:$0xf] %vm3822_vm3, %v4911_v59  ;;  %v4781_v42 = vpack.c.bf16 %v2662_v36, %v2662_v36  ;;  %v4909_v43 = vpack.c.bf16 %v2790_v37, %v2790_v37  ;;  %v2003_v45 = vadd.f32 %v6361_v35, %v2002_v40 }
 0x1d0   : > { %v2515_v46 = vadd.f32 %v6361_v35, %v2514_v41  ;;  %v2665_v47 = vmax.f32 %v2011_v38, 0.0  ;;  %v2793_v48 = vmax.f32 %v2523_v39, 0.0  ;;  %v5177_v49 = vpop.f32.mrf.mxu0  ;;  %v5305_v50 = vpop.f32.mrf.mxu1 }
 0x1d1   : > { %3943 = vst.msk [vmem:[%s5723_s27 + $0x1e0] sm:$0xf] %vm3822_vm3, %v4781_v42  ;;  %4071 = vst.msk [vmem:[%s5723_s27 + $0x3e0] sm:$0xf] %vm3822_vm3, %v4909_v43  ;;  %v2663_v51 = vmax.f32 %v2003_v45, 0.0  ;;  %v2024_v53 = vadd.f32 %v6361_v35, %v5177_v49  ;;  %v2536_v54 = vadd.f32 %v6361_v35, %v5305_v50 }
 0x1d2   : > { %v2791_v52 = vmax.f32 %v2515_v46, 0.0  ;;  %v4784_v55 = vpack.c.bf16 %v2665_v47, %v2665_v47  ;;  %v4912_v56 = vpack.c.bf16 %v2793_v48, %v2793_v48  ;;  %v2015_v57 = vpop.f32.mrf.mxu0  ;;  %v2527_v58 = vpop.f32.mrf.mxu1 }
 0x1d3   : > { %v4782_v60 = vpack.c.bf16 %v2663_v51, %v2663_v51  ;;  %v2668_v61 = vmax.f32 %v2024_v53, 0.0  ;;  %v2796_v62 = vmax.f32 %v2536_v54, 0.0  ;;  %v2016_v63 = vadd.f32 %v6361_v35, %v2015_v57 }
 0x1d4   : > { %v4910_v44 = vpack.c.bf16 %v2791_v52, %v2791_v52  ;;  %3946 = vst.msk [vmem:[%s5723_s27 + $0x1ec] sm:$0xf] %vm3822_vm3, %v4784_v55  ;;  %4074 = vst.msk [vmem:[%s5723_s27 + $0x3ec] sm:$0xf] %vm3822_vm3, %v4912_v56  ;;  %v2528_v0 = vadd.f32 %v6361_v35, %v2527_v58  ;;  %v5178_v1 = vpop.f32.mrf.mxu0  ;;  %v5306_v2 = vpop.f32.mrf.mxu1 }
 0x1d5   : > { %3944 = vst.msk [vmem:[%s5723_s27 + $0x1e4] sm:$0xf] %vm3822_vm3, %v4782_v60  ;;  %v4787_v3 = vpack.c.bf16 %v2668_v61, %v2668_v61  ;;  %v4915_v4 = vpack.c.bf16 %v2796_v62, %v2796_v62  ;;  %v2027_v5 = vadd.f32 %v6361_v35, %v5178_v1  ;;  %v2539_v6 = vadd.f32 %v6361_v35, %v5306_v2 }
 0x1d6   : > { %4072 = vst.msk [vmem:[%s5723_s27 + $0x3e4] sm:$0xf] %vm3822_vm3, %v4910_v44  ;;  %v2666_v7 = vmax.f32 %v2016_v63, 0.0  ;;  %v2794_v8 = vmax.f32 %v2528_v0, 0.0  ;;  %v2018_v9 = vpop.f32.mrf.mxu0  ;;  %v2530_v10 = vpop.f32.mrf.mxu1 }
 0x1d7   : > { %3949 = vst.msk [vmem:[%s5723_s27 + $0x1f8] sm:$0xf] %vm3822_vm3, %v4787_v3  ;;  %4077 = vst.msk [vmem:[%s5723_s27 + $0x3f8] sm:$0xf] %vm3822_vm3, %v4915_v4  ;;  %v2669_v11 = vmax.f32 %v2027_v5, 0.0  ;;  %v2797_v12 = vmax.f32 %v2539_v6, 0.0  ;;  %v2019_v13 = vadd.f32 %v6361_v35, %v2018_v9  ;;  %v2531_v14 = vadd.f32 %v6361_v35, %v2530_v10 }
 0x1d8   : > { %v4785_v15 = vpack.c.bf16 %v2666_v7, %v2666_v7  ;;  %v4913_v16 = vpack.c.bf16 %v2794_v8, %v2794_v8 }
 0x1d9   : > { %v4788_v17 = vpack.c.bf16 %v2669_v11, %v2669_v11  ;;  %v4916_v18 = vpack.c.bf16 %v2797_v12, %v2797_v12  ;;  %v2667_v19 = vmax.f32 %v2019_v13, 0.0  ;;  %v2795_v20 = vmax.f32 %v2531_v14, 0.0 }
 0x1da   : > { %3947 = vst.msk [vmem:[%s5723_s27 + $0x1f0] sm:$0xf] %vm3822_vm3, %v4785_v15  ;;  %4075 = vst.msk [vmem:[%s5723_s27 + $0x3f0] sm:$0xf] %vm3822_vm3, %v4913_v16 }
 0x1db   : > { %3950 = vst.msk [vmem:[%s5723_s27 + $0x1fc] sm:$0xf] %vm3822_vm3, %v4788_v17  ;;  %4078 = vst.msk [vmem:[%s5723_s27 + $0x3fc] sm:$0xf] %vm3822_vm3, %v4916_v18  ;;  %v4786_v21 = vpack.c.bf16 %v2667_v19, %v2667_v19  ;;  %v4914_v22 = vpack.c.bf16 %v2795_v20, %v2795_v20 }
 0x1dd   : > { %3948 = vst.msk [vmem:[%s5723_s27 + $0x1f4] sm:$0xf] %vm3822_vm3, %v4786_v21  ;;  %4076 = vst.msk [vmem:[%s5723_s27 + $0x3f4] sm:$0xf] %vm3822_vm3, %v4914_v22 }
 0x1de PF: > { %s13_s12 = sadd.s32 1, %s5458_s12  }
 0x1df   : > { %p10_p4 = scmp.ge.s32.totalorder %s13_s12, 4  }
 0x1e1   :  { %12 = sbr.rel (!%p10_p4) target bundleno = 1 (0x1), region = 62 }

</bundles_post_ra>
